<compile_context>
chip_gen: v6e
topology: v6e:2x2x1
jax: 0.10.0
libtpu: 0.0.40
codegen_flags: <defaults>
</compile_context>

<pallas_src>
import functools

import jax
import jax.numpy as jnp
from jax.experimental import pallas as pl
from jax.experimental.pallas import tpu as pltpu


def _lstm_kernel(x_ref, wih0_ref, wbig_ref, bias_ref, fcw_ref, fcb_ref,
                 out_ref, xproj_ref, *, T, B, H):
    # Column layout of every 8H-wide gate tensor: [i0 i1 | f0 f1 | o0 o1 | g0 g1]
    H2, H6, H8 = 2 * H, 6 * H, 8 * H

    # ---- one-shot padded layer-0 input projection for ALL timesteps ------------
    # wih0_ref has zeros in the layer-1 gate columns, bias_ref carries b0 in the
    # layer-0 columns and b1 in the layer-1 columns, so xproj rows are directly
    # addable to the fused recurrent matmul output.
    xproj_ref[...] = (jnp.dot(x_ref[...], wih0_ref[...],
                              preferred_element_type=jnp.float32)
                      + bias_ref[...])                            # (T*B, 8H)

    # ---- prologue: layer 0, timestep 0 (zero initial h/c => no recurrent term) --
    pre0 = xproj_ref[0:B, :]                                      # (B, 8H)
    i0 = jax.nn.sigmoid(pre0[:, 0:H])
    o0 = jax.nn.sigmoid(pre0[:, 4 * H:5 * H])
    g0 = jnp.tanh(pre0[:, 6 * H:7 * H])
    c0 = i0 * g0                                                  # f0 * c_prev == 0
    h0 = o0 * jnp.tanh(c0)
    zeros_h = jnp.zeros((B, H), jnp.float32)
    h_pk = jnp.concatenate([h0, zeros_h], axis=-1)                # (B, 2H) = [h0 | h1]
    c_pk = jnp.concatenate([c0, zeros_h], axis=-1)                # (B, 2H) = [c0 | c1]

    # ---- skewed main loop: iteration s fuses layer0[s] with layer1[s-1] --------
    # LHS of the fused matmul is exactly the packed state from the last iteration:
    #   [h0[s-1] | h1[s-2]] @ [[W_hh0 | W_ih1], [0 | W_hh1]]
    for s in range(1, T):
        fused = jnp.dot(h_pk, wbig_ref[...],
                        preferred_element_type=jnp.float32)       # (B, 8H)
        pre = fused + xproj_ref[s * B:(s + 1) * B, :]             # tile-aligned slice
        sig = jax.nn.sigmoid(pre[:, 0:H6])                        # [i0 i1 f0 f1 o0 o1]
        g = jnp.tanh(pre[:, H6:H8])                               # [g0 g1]
        i = sig[:, 0:H2]
        f = sig[:, H2:2 * H2]
        o = sig[:, 2 * H2:3 * H2]
        c_pk = f * c_pk + i * g                                   # -> [c0[s] | c1[s-1]]
        h_pk = o * jnp.tanh(c_pk)                                 # -> [h0[s] | h1[s-1]]

    # ---- epilogue: layer 1, timestep T-1 ----------------------------------------
    fused = jnp.dot(h_pk, wbig_ref[...], preferred_element_type=jnp.float32)
    pre = fused + bias_ref[...]
    i1 = jax.nn.sigmoid(pre[:, H:2 * H])
    f1 = jax.nn.sigmoid(pre[:, 3 * H:4 * H])
    o1 = jax.nn.sigmoid(pre[:, 5 * H:6 * H])
    g1 = jnp.tanh(pre[:, 7 * H:8 * H])
    c1 = f1 * c_pk[:, H:2 * H] + i1 * g1
    h1 = o1 * jnp.tanh(c1)                                        # top-layer h at t = T-1

    # ---- fc head: VPU multiply + lane reduction, lane-dense write ----------------
    res = jnp.sum(h1 * fcw_ref[...], axis=-1, keepdims=True) + fcb_ref[...]   # (B, 1)
    out_ref[...] = jnp.broadcast_to(res, out_ref.shape)


_OUT_LANES = 128
_SUBLANES = 8


@functools.partial(jax.jit, static_argnames=("hidden_size",))
def lstm_regressor_forward(x_btd, params, hidden_size=64):
    """x_btd: (B, T, D) float32, matching the PyTorch batch_first input."""
    B, T, D = x_btd.shape
    H = hidden_size
    B_pad = max(_SUBLANES, ((B + _SUBLANES - 1) // _SUBLANES) * _SUBLANES)

    # pad batch to a sublane multiple (zero rows are harmless and sliced off below)
    x_pad = jnp.zeros((B_pad, T, D), x_btd.dtype).at[:B].set(x_btd)
    # time-major then flatten (T, B_pad) so the layer-0 projection is one matmul
    # TODO(synk): at large B*T*D fold this transpose into a time-grid BlockSpec.
    x_flat = jnp.transpose(x_pad, (1, 0, 2)).reshape(T * B_pad, D)

    kernel = functools.partial(_lstm_kernel, T=T, B=B_pad, H=H)
    full = lambda i: (0, 0)

    out = pl.pallas_call(
        kernel,
        out_shape=jax.ShapeDtypeStruct((B_pad, _OUT_LANES), jnp.float32),
        grid_spec=pltpu.PrefetchScalarGridSpec(
            num_scalar_prefetch=0,
            grid=(1,),                                     # single grid point
            in_specs=[
                pl.BlockSpec((T * B_pad, D), full),        # x, whole (padded) sequence
                pl.BlockSpec((D, 8 * H), full),            # padded layer-0 input proj
                pl.BlockSpec((2 * H, 8 * H), full),        # fused recurrent weights
                pl.BlockSpec((1, 8 * H), full),            # combined biases
                pl.BlockSpec((1, H), full),                # fc weight row
                pl.BlockSpec((1, 1), full),                # fc bias
            ],
            out_specs=pl.BlockSpec((B_pad, _OUT_LANES), full),
            scratch_shapes=[
                pltpu.VMEM((T * B_pad, 8 * H), jnp.float32),   # xproj parking lot
            ],
        ),
        compiler_params=pltpu.CompilerParams(
            dimension_semantics=("arbitrary",)),
    )(x_flat, params["wih0_pad"], params["w_big"], params["bias_pad"],
      params["fcw_row"], params["fcb"])
    return out[:B, :1]


# ----------------------------- parameter handling -------------------------------

def init_raw_params(key, input_size, hidden_size):
    """PyTorch-layout LSTM + Linear params (uniform +-1/sqrt(H)), gate order i,f,g,o."""
    H = hidden_size
    scale = 1.0 / jnp.sqrt(jnp.float32(H))
    keys = jax.random.split(key, 10)
    u = lambda k, shape: jax.random.uniform(k, shape, jnp.float32, -scale, scale)
    return {
        "w_ih_l0": u(keys[0], (4 * H, input_size)),
        "w_hh_l0": u(keys[1], (4 * H, H)),
        "b_ih_l0": u(keys[2], (4 * H,)),
        "b_hh_l0": u(keys[3], (4 * H,)),
        "w_ih_l1": u(keys[4], (4 * H, H)),
        "w_hh_l1": u(keys[5], (4 * H, H)),
        "b_ih_l1": u(keys[6], (4 * H,)),
        "b_hh_l1": u(keys[7], (4 * H,)),
        "fc_w": u(keys[8], (1, H)),
        "fc_b": u(keys[9], (1,)),
    }


def _gate_split(v, H):
    """Split PyTorch gate-stacked (4H, ...) into (i, f, g, o) blocks along axis 0."""
    return v[0:H], v[H:2 * H], v[2 * H:3 * H], v[3 * H:4 * H]


def pack_params(raw):
    """Pack PyTorch-layout params into the skewed-fused kernel layout.

    Column layout for every 8H-wide tensor: [i0 i1 | f0 f1 | o0 o1 | g0 g1].
    """
    H = raw["w_hh_l0"].shape[1]
    D = raw["w_ih_l0"].shape[1]

    i0h, f0h, g0h, o0h = _gate_split(raw["w_hh_l0"], H)    # act on h0 (layer-0 recurrent)
    i1x, f1x, g1x, o1x = _gate_split(raw["w_ih_l1"], H)    # act on h0 (layer-1 input)
    i1h, f1h, g1h, o1h = _gate_split(raw["w_hh_l1"], H)    # act on h1 (layer-1 recurrent)
    z = jnp.zeros((H, H), jnp.float32)

    # fused recurrent weight: LHS = [h0 | h1]
    top = jnp.concatenate(
        [i0h.T, i1x.T, f0h.T, f1x.T, o0h.T, o1x.T, g0h.T, g1x.T], axis=1)   # (H, 8H)
    bot = jnp.concatenate(
        [z, i1h.T, z, f1h.T, z, o1h.T, z, g1h.T], axis=1)                   # (H, 8H)
    w_big = jnp.concatenate([top, bot], axis=0)                             # (2H, 8H)

    # layer-0 input projection padded to the 8H layout (zeros in layer-1 columns)
    i0x, f0x, g0x, o0x = _gate_split(raw["w_ih_l0"], H)                     # (H, D) blocks
    zD = jnp.zeros((D, H), jnp.float32)
    wih0_pad = jnp.concatenate(
        [i0x.T, zD, f0x.T, zD, o0x.T, zD, g0x.T, zD], axis=1)               # (D, 8H)

    # combined biases: b0 = b_ih0 + b_hh0 in layer-0 cols, b1 in layer-1 cols
    b0 = raw["b_ih_l0"] + raw["b_hh_l0"]
    b1 = raw["b_ih_l1"] + raw["b_hh_l1"]
    bi0, bf0, bg0, bo0 = _gate_split(b0, H)
    bi1, bf1, bg1, bo1 = _gate_split(b1, H)
    bias_pad = jnp.concatenate(
        [bi0, bi1, bf0, bf1, bo0, bo1, bg0, bg1]).reshape(1, 8 * H)

    return {
        "wih0_pad": wih0_pad,                              # (D, 8H)
        "w_big": w_big,                                    # (2H, 8H)
        "bias_pad": bias_pad,                              # (1, 8H)
        "fcw_row": raw["fc_w"],                            # (1, H)
        "fcb": raw["fc_b"].reshape(1, 1),                  # (1, 1)
    }


# ------------------------------ pure-JAX reference ------------------------------

def lstm_regressor_ref(x_btd, raw, hidden_size=64):
    """Same math as nn.LSTM(2 layers, batch_first) + Linear, eval mode."""
    B, T, D = x_btd.shape
    H = hidden_size

    def layer(x_seq, w_ih, w_hh, b_ih, b_hh):
        wih_t, whh_t = w_ih.T, w_hh.T
        b = (b_ih + b_hh)[None, :]

        def step(carry, x_t):
            h, c = carry
            gates = x_t @ wih_t + h @ whh_t + b
            i = jax.nn.sigmoid(gates[:, 0:H])
            f = jax.nn.sigmoid(gates[:, H:2 * H])
            g = jnp.tanh(gates[:, 2 * H:3 * H])
            o = jax.nn.sigmoid(gates[:, 3 * H:4 * H])
            c_new = f * c + i * g
            h_new = o * jnp.tanh(c_new)
            return (h_new, c_new), h_new

        init = (jnp.zeros((B, H), jnp.float32), jnp.zeros((B, H), jnp.float32))
        _, hs = jax.lax.scan(step, init, jnp.transpose(x_seq, (1, 0, 2)))
        return jnp.transpose(hs, (1, 0, 2))                # (B, T, H)

    h_l0 = layer(x_btd, raw["w_ih_l0"], raw["w_hh_l0"], raw["b_ih_l0"], raw["b_hh_l0"])
    # inter-layer dropout is identity at inference
    h_l1 = layer(h_l0, raw["w_ih_l1"], raw["w_hh_l1"], raw["b_ih_l1"], raw["b_hh_l1"])
    last = h_l1[:, -1, :]
    return last @ raw["fc_w"].T + raw["fc_b"]


if __name__ == "__main__":
    B, T, D, H = 2, 8, 16, 64
    key = jax.random.PRNGKey(0)
    k_x, k_p = jax.random.split(key)

    x = jax.random.normal(k_x, (B, T, D), jnp.float32)
    raw = init_raw_params(k_p, D, H)
    params = pack_params(raw)

    out = lstm_regressor_forward(x, params, hidden_size=H)
    out = jax.block_until_ready(out)

    ref = lstm_regressor_ref(x, raw, hidden_size=H)
    assert out.shape == (B, 1), out.shape
    assert jnp.allclose(out, ref, atol=1e-5, rtol=1e-5), (out, ref)

    print("KERNEL_OK")
</pallas_src>

<mosaic_0001>
module attributes {stable_mosaic.version = 11 : i64} {
  func.func @_lstm_kernel(%arg0: i32, %arg1: memref<64x16xf32, #tpu.memory_space<vmem>>, %arg2: memref<16x512xf32, #tpu.memory_space<vmem>>, %arg3: memref<128x512xf32, #tpu.memory_space<vmem>>, %arg4: memref<1x512xf32, #tpu.memory_space<vmem>>, %arg5: memref<1x64xf32, #tpu.memory_space<vmem>>, %arg6: memref<1x1xf32, #tpu.memory_space<vmem>>, %arg7: memref<8x128xf32, #tpu.memory_space<vmem>>, %arg8: memref<64x512xf32, #tpu.memory_space<vmem>>) attributes {dimension_semantics = [#tpu.dimension_semantics<arbitrary>], iteration_bounds = array<i64: 1>, scalar_prefetch = 0 : i64, scratch_operands = 1 : i64, tpu.core_type = #tpu.core_type<tc>, window_params = [{pipeline_mode = #tpu.pipeline_mode<synchronous>, transform_indices = @transform_0, window_bounds = array<i64: 64, 16>}, {pipeline_mode = #tpu.pipeline_mode<synchronous>, transform_indices = @transform_1, window_bounds = array<i64: 16, 512>}, {pipeline_mode = #tpu.pipeline_mode<synchronous>, transform_indices = @transform_2, window_bounds = array<i64: 128, 512>}, {pipeline_mode = #tpu.pipeline_mode<synchronous>, transform_indices = @transform_3, window_bounds = array<i64: 1, 512>}, {pipeline_mode = #tpu.pipeline_mode<synchronous>, transform_indices = @transform_4, window_bounds = array<i64: 1, 64>}, {pipeline_mode = #tpu.pipeline_mode<synchronous>, transform_indices = @transform_5, window_bounds = array<i64: 1, 1>}, {pipeline_mode = #tpu.pipeline_mode<synchronous>, transform_indices = @transform_6, window_bounds = array<i64: 8, 128>}]} {
    %c0 = arith.constant 0 : index
    %c0_0 = arith.constant 0 : index
    %0 = vector.load %arg1[%c0, %c0_0] : memref<64x16xf32, #tpu.memory_space<vmem>>, vector<64x16xf32>
    %c0_1 = arith.constant 0 : index
    %c0_2 = arith.constant 0 : index
    %1 = vector.load %arg2[%c0_1, %c0_2] : memref<16x512xf32, #tpu.memory_space<vmem>>, vector<16x512xf32>
    %cst = arith.constant dense<0.000000e+00> : vector<64x512xf32>
    %2 = tpu.matmul %0, %1, %cst {dimension_numbers = #tpu.dot_dimension_numbers<[1], [0], [0], [1], [0, 0, 1, 1], [], []>} : vector<64x16xf32>, vector<16x512xf32>, vector<64x512xf32> -> vector<64x512xf32>
    %c0_3 = arith.constant 0 : index
    %c0_4 = arith.constant 0 : index
    %3 = vector.load %arg4[%c0_3, %c0_4] : memref<1x512xf32, #tpu.memory_space<vmem>>, vector<1x512xf32>
    %4 = vector.broadcast %3 : vector<1x512xf32> to vector<64x512xf32>
    %5 = arith.addf %2, %4 : vector<64x512xf32>
    %c0_5 = arith.constant 0 : index
    %c0_6 = arith.constant 0 : index
    %6 = vector.load %arg8[%c0_5, %c0_6] : memref<64x512xf32, #tpu.memory_space<vmem>>, vector<64x512xf32>
    tpu.vector_store %arg8[%c0_5, %c0_6], %5 {strides = array<i32>} : memref<64x512xf32, #tpu.memory_space<vmem>>, vector<64x512xf32>,
    %c0_7 = arith.constant 0 : index
    %c0_8 = arith.constant 0 : index
    %7 = vector.load %arg8[%c0_7, %c0_8] : memref<64x512xf32, #tpu.memory_space<vmem>>, vector<8x512xf32>
    %8 = vector.extract_strided_slice %7 {offsets = [0, 0], sizes = [8, 64], strides = [1, 1]} : vector<8x512xf32> to vector<8x64xf32>
    %9 = arith.negf %8 : vector<8x64xf32>
    %10 = math.exp %9 : vector<8x64xf32>
    %cst_9 = arith.constant 1.000000e+00 : f32
    %11 = vector.broadcast %cst_9 : f32 to vector<8x64xf32>
    %12 = arith.addf %11, %10 : vector<8x64xf32>
    %13 = arith.divf %11, %12 : vector<8x64xf32>
    %14 = vector.extract_strided_slice %7 {offsets = [0, 256], sizes = [8, 64], strides = [1, 1]} : vector<8x512xf32> to vector<8x64xf32>
    %15 = arith.negf %14 : vector<8x64xf32>
    %16 = math.exp %15 : vector<8x64xf32>
    %cst_10 = arith.constant 1.000000e+00 : f32
    %17 = vector.broadcast %cst_10 : f32 to vector<8x64xf32>
    %18 = arith.addf %17, %16 : vector<8x64xf32>
    %19 = arith.divf %17, %18 : vector<8x64xf32>
    %20 = vector.extract_strided_slice %7 {offsets = [0, 384], sizes = [8, 64], strides = [1, 1]} : vector<8x512xf32> to vector<8x64xf32>
    %21 = math.tanh %20 : vector<8x64xf32>
    %22 = arith.mulf %13, %21 : vector<8x64xf32>
    %23 = math.tanh %22 : vector<8x64xf32>
    %24 = arith.mulf %19, %23 : vector<8x64xf32>
    %cst_11 = arith.constant 0.000000e+00 : f32
    %25 = vector.broadcast %cst_11 : f32 to vector<8x64xf32>
    %26 = tpu.concatenate %24, %25 in 1 : vector<8x64xf32>, vector<8x64xf32> -> vector<8x128xf32>
    %27 = tpu.concatenate %22, %25 in 1 : vector<8x64xf32>, vector<8x64xf32> -> vector<8x128xf32>
    %c0_12 = arith.constant 0 : index
    %c0_13 = arith.constant 0 : index
    %28 = vector.load %arg3[%c0_12, %c0_13] : memref<128x512xf32, #tpu.memory_space<vmem>>, vector<128x512xf32>
    %cst_14 = arith.constant dense<0.000000e+00> : vector<8x512xf32>
    %29 = tpu.matmul %26, %28, %cst_14 {dimension_numbers = #tpu.dot_dimension_numbers<[1], [0], [0], [1], [0, 0, 1, 1], [], []>} : vector<8x128xf32>, vector<128x512xf32>, vector<8x512xf32> -> vector<8x512xf32>
    %c8 = arith.constant 8 : index
    %c0_15 = arith.constant 0 : index
    %30 = vector.load %arg8[%c8, %c0_15] : memref<64x512xf32, #tpu.memory_space<vmem>>, vector<8x512xf32>
    %31 = arith.addf %29, %30 : vector<8x512xf32>
    %32 = vector.extract_strided_slice %31 {offsets = [0, 0], sizes = [8, 384], strides = [1, 1]} : vector<8x512xf32> to vector<8x384xf32>
    %33 = arith.negf %32 : vector<8x384xf32>
    %34 = math.exp %33 : vector<8x384xf32>
    %cst_16 = arith.constant 1.000000e+00 : f32
    %35 = vector.broadcast %cst_16 : f32 to vector<8x384xf32>
    %36 = arith.addf %35, %34 : vector<8x384xf32>
    %37 = arith.divf %35, %36 : vector<8x384xf32>
    %38 = vector.extract_strided_slice %31 {offsets = [0, 384], sizes = [8, 128], strides = [1, 1]} : vector<8x512xf32> to vector<8x128xf32>
    %39 = math.tanh %38 : vector<8x128xf32>
    %40 = vector.extract_strided_slice %37 {offsets = [0, 0], sizes = [8, 128], strides = [1, 1]} : vector<8x384xf32> to vector<8x128xf32>
    %41 = vector.extract_strided_slice %37 {offsets = [0, 128], sizes = [8, 128], strides = [1, 1]} : vector<8x384xf32> to vector<8x128xf32>
    %42 = vector.extract_strided_slice %37 {offsets = [0, 256], sizes = [8, 128], strides = [1, 1]} : vector<8x384xf32> to vector<8x128xf32>
    %43 = arith.mulf %41, %27 : vector<8x128xf32>
    %44 = arith.mulf %40, %39 : vector<8x128xf32>
    %45 = arith.addf %43, %44 : vector<8x128xf32>
    %46 = math.tanh %45 : vector<8x128xf32>
    %47 = arith.mulf %42, %46 : vector<8x128xf32>
    %c0_17 = arith.constant 0 : index
    %c0_18 = arith.constant 0 : index
    %48 = vector.load %arg3[%c0_17, %c0_18] : memref<128x512xf32, #tpu.memory_space<vmem>>, vector<128x512xf32>
    %cst_19 = arith.constant dense<0.000000e+00> : vector<8x512xf32>
    %49 = tpu.matmul %47, %48, %cst_19 {dimension_numbers = #tpu.dot_dimension_numbers<[1], [0], [0], [1], [0, 0, 1, 1], [], []>} : vector<8x128xf32>, vector<128x512xf32>, vector<8x512xf32> -> vector<8x512xf32>
    %c16 = arith.constant 16 : index
    %c0_20 = arith.constant 0 : index
    %50 = vector.load %arg8[%c16, %c0_20] : memref<64x512xf32, #tpu.memory_space<vmem>>, vector<8x512xf32>
    %51 = arith.addf %49, %50 : vector<8x512xf32>
    %52 = vector.extract_strided_slice %51 {offsets = [0, 0], sizes = [8, 384], strides = [1, 1]} : vector<8x512xf32> to vector<8x384xf32>
    %53 = arith.negf %52 : vector<8x384xf32>
    %54 = math.exp %53 : vector<8x384xf32>
    %cst_21 = arith.constant 1.000000e+00 : f32
    %55 = vector.broadcast %cst_21 : f32 to vector<8x384xf32>
    %56 = arith.addf %55, %54 : vector<8x384xf32>
    %57 = arith.divf %55, %56 : vector<8x384xf32>
    %58 = vector.extract_strided_slice %51 {offsets = [0, 384], sizes = [8, 128], strides = [1, 1]} : vector<8x512xf32> to vector<8x128xf32>
    %59 = math.tanh %58 : vector<8x128xf32>
    %60 = vector.extract_strided_slice %57 {offsets = [0, 0], sizes = [8, 128], strides = [1, 1]} : vector<8x384xf32> to vector<8x128xf32>
    %61 = vector.extract_strided_slice %57 {offsets = [0, 128], sizes = [8, 128], strides = [1, 1]} : vector<8x384xf32> to vector<8x128xf32>
    %62 = vector.extract_strided_slice %57 {offsets = [0, 256], sizes = [8, 128], strides = [1, 1]} : vector<8x384xf32> to vector<8x128xf32>
    %63 = arith.mulf %61, %45 : vector<8x128xf32>
    %64 = arith.mulf %60, %59 : vector<8x128xf32>
    %65 = arith.addf %63, %64 : vector<8x128xf32>
    %66 = math.tanh %65 : vector<8x128xf32>
    %67 = arith.mulf %62, %66 : vector<8x128xf32>
    %c0_22 = arith.constant 0 : index
    %c0_23 = arith.constant 0 : index
    %68 = vector.load %arg3[%c0_22, %c0_23] : memref<128x512xf32, #tpu.memory_space<vmem>>, vector<128x512xf32>
    %cst_24 = arith.constant dense<0.000000e+00> : vector<8x512xf32>
    %69 = tpu.matmul %67, %68, %cst_24 {dimension_numbers = #tpu.dot_dimension_numbers<[1], [0], [0], [1], [0, 0, 1, 1], [], []>} : vector<8x128xf32>, vector<128x512xf32>, vector<8x512xf32> -> vector<8x512xf32>
    %c24 = arith.constant 24 : index
    %c0_25 = arith.constant 0 : index
    %70 = vector.load %arg8[%c24, %c0_25] : memref<64x512xf32, #tpu.memory_space<vmem>>, vector<8x512xf32>
    %71 = arith.addf %69, %70 : vector<8x512xf32>
    %72 = vector.extract_strided_slice %71 {offsets = [0, 0], sizes = [8, 384], strides = [1, 1]} : vector<8x512xf32> to vector<8x384xf32>
    %73 = arith.negf %72 : vector<8x384xf32>
    %74 = math.exp %73 : vector<8x384xf32>
    %cst_26 = arith.constant 1.000000e+00 : f32
    %75 = vector.broadcast %cst_26 : f32 to vector<8x384xf32>
    %76 = arith.addf %75, %74 : vector<8x384xf32>
    %77 = arith.divf %75, %76 : vector<8x384xf32>
    %78 = vector.extract_strided_slice %71 {offsets = [0, 384], sizes = [8, 128], strides = [1, 1]} : vector<8x512xf32> to vector<8x128xf32>
    %79 = math.tanh %78 : vector<8x128xf32>
    %80 = vector.extract_strided_slice %77 {offsets = [0, 0], sizes = [8, 128], strides = [1, 1]} : vector<8x384xf32> to vector<8x128xf32>
    %81 = vector.extract_strided_slice %77 {offsets = [0, 128], sizes = [8, 128], strides = [1, 1]} : vector<8x384xf32> to vector<8x128xf32>
    %82 = vector.extract_strided_slice %77 {offsets = [0, 256], sizes = [8, 128], strides = [1, 1]} : vector<8x384xf32> to vector<8x128xf32>
    %83 = arith.mulf %81, %65 : vector<8x128xf32>
    %84 = arith.mulf %80, %79 : vector<8x128xf32>
    %85 = arith.addf %83, %84 : vector<8x128xf32>
    %86 = math.tanh %85 : vector<8x128xf32>
    %87 = arith.mulf %82, %86 : vector<8x128xf32>
    %c0_27 = arith.constant 0 : index
    %c0_28 = arith.constant 0 : index
    %88 = vector.load %arg3[%c0_27, %c0_28] : memref<128x512xf32, #tpu.memory_space<vmem>>, vector<128x512xf32>
    %cst_29 = arith.constant dense<0.000000e+00> : vector<8x512xf32>
    %89 = tpu.matmul %87, %88, %cst_29 {dimension_numbers = #tpu.dot_dimension_numbers<[1], [0], [0], [1], [0, 0, 1, 1], [], []>} : vector<8x128xf32>, vector<128x512xf32>, vector<8x512xf32> -> vector<8x512xf32>
    %c32 = arith.constant 32 : index
    %c0_30 = arith.constant 0 : index
    %90 = vector.load %arg8[%c32, %c0_30] : memref<64x512xf32, #tpu.memory_space<vmem>>, vector<8x512xf32>
    %91 = arith.addf %89, %90 : vector<8x512xf32>
    %92 = vector.extract_strided_slice %91 {offsets = [0, 0], sizes = [8, 384], strides = [1, 1]} : vector<8x512xf32> to vector<8x384xf32>
    %93 = arith.negf %92 : vector<8x384xf32>
    %94 = math.exp %93 : vector<8x384xf32>
    %cst_31 = arith.constant 1.000000e+00 : f32
    %95 = vector.broadcast %cst_31 : f32 to vector<8x384xf32>
    %96 = arith.addf %95, %94 : vector<8x384xf32>
    %97 = arith.divf %95, %96 : vector<8x384xf32>
    %98 = vector.extract_strided_slice %91 {offsets = [0, 384], sizes = [8, 128], strides = [1, 1]} : vector<8x512xf32> to vector<8x128xf32>
    %99 = math.tanh %98 : vector<8x128xf32>
    %100 = vector.extract_strided_slice %97 {offsets = [0, 0], sizes = [8, 128], strides = [1, 1]} : vector<8x384xf32> to vector<8x128xf32>
    %101 = vector.extract_strided_slice %97 {offsets = [0, 128], sizes = [8, 128], strides = [1, 1]} : vector<8x384xf32> to vector<8x128xf32>
    %102 = vector.extract_strided_slice %97 {offsets = [0, 256], sizes = [8, 128], strides = [1, 1]} : vector<8x384xf32> to vector<8x128xf32>
    %103 = arith.mulf %101, %85 : vector<8x128xf32>
    %104 = arith.mulf %100, %99 : vector<8x128xf32>
    %105 = arith.addf %103, %104 : vector<8x128xf32>
    %106 = math.tanh %105 : vector<8x128xf32>
    %107 = arith.mulf %102, %106 : vector<8x128xf32>
    %c0_32 = arith.constant 0 : index
    %c0_33 = arith.constant 0 : index
    %108 = vector.load %arg3[%c0_32, %c0_33] : memref<128x512xf32, #tpu.memory_space<vmem>>, vector<128x512xf32>
    %cst_34 = arith.constant dense<0.000000e+00> : vector<8x512xf32>
    %109 = tpu.matmul %107, %108, %cst_34 {dimension_numbers = #tpu.dot_dimension_numbers<[1], [0], [0], [1], [0, 0, 1, 1], [], []>} : vector<8x128xf32>, vector<128x512xf32>, vector<8x512xf32> -> vector<8x512xf32>
    %c40 = arith.constant 40 : index
    %c0_35 = arith.constant 0 : index
    %110 = vector.load %arg8[%c40, %c0_35] : memref<64x512xf32, #tpu.memory_space<vmem>>, vector<8x512xf32>
    %111 = arith.addf %109, %110 : vector<8x512xf32>
    %112 = vector.extract_strided_slice %111 {offsets = [0, 0], sizes = [8, 384], strides = [1, 1]} : vector<8x512xf32> to vector<8x384xf32>
    %113 = arith.negf %112 : vector<8x384xf32>
    %114 = math.exp %113 : vector<8x384xf32>
    %cst_36 = arith.constant 1.000000e+00 : f32
    %115 = vector.broadcast %cst_36 : f32 to vector<8x384xf32>
    %116 = arith.addf %115, %114 : vector<8x384xf32>
    %117 = arith.divf %115, %116 : vector<8x384xf32>
    %118 = vector.extract_strided_slice %111 {offsets = [0, 384], sizes = [8, 128], strides = [1, 1]} : vector<8x512xf32> to vector<8x128xf32>
    %119 = math.tanh %118 : vector<8x128xf32>
    %120 = vector.extract_strided_slice %117 {offsets = [0, 0], sizes = [8, 128], strides = [1, 1]} : vector<8x384xf32> to vector<8x128xf32>
    %121 = vector.extract_strided_slice %117 {offsets = [0, 128], sizes = [8, 128], strides = [1, 1]} : vector<8x384xf32> to vector<8x128xf32>
    %122 = vector.extract_strided_slice %117 {offsets = [0, 256], sizes = [8, 128], strides = [1, 1]} : vector<8x384xf32> to vector<8x128xf32>
    %123 = arith.mulf %121, %105 : vector<8x128xf32>
    %124 = arith.mulf %120, %119 : vector<8x128xf32>
    %125 = arith.addf %123, %124 : vector<8x128xf32>
    %126 = math.tanh %125 : vector<8x128xf32>
    %127 = arith.mulf %122, %126 : vector<8x128xf32>
    %c0_37 = arith.constant 0 : index
    %c0_38 = arith.constant 0 : index
    %128 = vector.load %arg3[%c0_37, %c0_38] : memref<128x512xf32, #tpu.memory_space<vmem>>, vector<128x512xf32>
    %cst_39 = arith.constant dense<0.000000e+00> : vector<8x512xf32>
    %129 = tpu.matmul %127, %128, %cst_39 {dimension_numbers = #tpu.dot_dimension_numbers<[1], [0], [0], [1], [0, 0, 1, 1], [], []>} : vector<8x128xf32>, vector<128x512xf32>, vector<8x512xf32> -> vector<8x512xf32>
    %c48 = arith.constant 48 : index
    %c0_40 = arith.constant 0 : index
    %130 = vector.load %arg8[%c48, %c0_40] : memref<64x512xf32, #tpu.memory_space<vmem>>, vector<8x512xf32>
    %131 = arith.addf %129, %130 : vector<8x512xf32>
    %132 = vector.extract_strided_slice %131 {offsets = [0, 0], sizes = [8, 384], strides = [1, 1]} : vector<8x512xf32> to vector<8x384xf32>
    %133 = arith.negf %132 : vector<8x384xf32>
    %134 = math.exp %133 : vector<8x384xf32>
    %cst_41 = arith.constant 1.000000e+00 : f32
    %135 = vector.broadcast %cst_41 : f32 to vector<8x384xf32>
    %136 = arith.addf %135, %134 : vector<8x384xf32>
    %137 = arith.divf %135, %136 : vector<8x384xf32>
    %138 = vector.extract_strided_slice %131 {offsets = [0, 384], sizes = [8, 128], strides = [1, 1]} : vector<8x512xf32> to vector<8x128xf32>
    %139 = math.tanh %138 : vector<8x128xf32>
    %140 = vector.extract_strided_slice %137 {offsets = [0, 0], sizes = [8, 128], strides = [1, 1]} : vector<8x384xf32> to vector<8x128xf32>
    %141 = vector.extract_strided_slice %137 {offsets = [0, 128], sizes = [8, 128], strides = [1, 1]} : vector<8x384xf32> to vector<8x128xf32>
    %142 = vector.extract_strided_slice %137 {offsets = [0, 256], sizes = [8, 128], strides = [1, 1]} : vector<8x384xf32> to vector<8x128xf32>
    %143 = arith.mulf %141, %125 : vector<8x128xf32>
    %144 = arith.mulf %140, %139 : vector<8x128xf32>
    %145 = arith.addf %143, %144 : vector<8x128xf32>
    %146 = math.tanh %145 : vector<8x128xf32>
    %147 = arith.mulf %142, %146 : vector<8x128xf32>
    %c0_42 = arith.constant 0 : index
    %c0_43 = arith.constant 0 : index
    %148 = vector.load %arg3[%c0_42, %c0_43] : memref<128x512xf32, #tpu.memory_space<vmem>>, vector<128x512xf32>
    %cst_44 = arith.constant dense<0.000000e+00> : vector<8x512xf32>
    %149 = tpu.matmul %147, %148, %cst_44 {dimension_numbers = #tpu.dot_dimension_numbers<[1], [0], [0], [1], [0, 0, 1, 1], [], []>} : vector<8x128xf32>, vector<128x512xf32>, vector<8x512xf32> -> vector<8x512xf32>
    %c56 = arith.constant 56 : index
    %c0_45 = arith.constant 0 : index
    %150 = vector.load %arg8[%c56, %c0_45] : memref<64x512xf32, #tpu.memory_space<vmem>>, vector<8x512xf32>
    %151 = arith.addf %149, %150 : vector<8x512xf32>
    %152 = vector.extract_strided_slice %151 {offsets = [0, 0], sizes = [8, 384], strides = [1, 1]} : vector<8x512xf32> to vector<8x384xf32>
    %153 = arith.negf %152 : vector<8x384xf32>
    %154 = math.exp %153 : vector<8x384xf32>
    %cst_46 = arith.constant 1.000000e+00 : f32
    %155 = vector.broadcast %cst_46 : f32 to vector<8x384xf32>
    %156 = arith.addf %155, %154 : vector<8x384xf32>
    %157 = arith.divf %155, %156 : vector<8x384xf32>
    %158 = vector.extract_strided_slice %151 {offsets = [0, 384], sizes = [8, 128], strides = [1, 1]} : vector<8x512xf32> to vector<8x128xf32>
    %159 = math.tanh %158 : vector<8x128xf32>
    %160 = vector.extract_strided_slice %157 {offsets = [0, 0], sizes = [8, 128], strides = [1, 1]} : vector<8x384xf32> to vector<8x128xf32>
    %161 = vector.extract_strided_slice %157 {offsets = [0, 128], sizes = [8, 128], strides = [1, 1]} : vector<8x384xf32> to vector<8x128xf32>
    %162 = vector.extract_strided_slice %157 {offsets = [0, 256], sizes = [8, 128], strides = [1, 1]} : vector<8x384xf32> to vector<8x128xf32>
    %163 = arith.mulf %161, %145 : vector<8x128xf32>
    %164 = arith.mulf %160, %159 : vector<8x128xf32>
    %165 = arith.addf %163, %164 : vector<8x128xf32>
    %166 = math.tanh %165 : vector<8x128xf32>
    %167 = arith.mulf %162, %166 : vector<8x128xf32>
    %c0_47 = arith.constant 0 : index
    %c0_48 = arith.constant 0 : index
    %168 = vector.load %arg3[%c0_47, %c0_48] : memref<128x512xf32, #tpu.memory_space<vmem>>, vector<128x512xf32>
    %cst_49 = arith.constant dense<0.000000e+00> : vector<8x512xf32>
    %169 = tpu.matmul %167, %168, %cst_49 {dimension_numbers = #tpu.dot_dimension_numbers<[1], [0], [0], [1], [0, 0, 1, 1], [], []>} : vector<8x128xf32>, vector<128x512xf32>, vector<8x512xf32> -> vector<8x512xf32>
    %c0_50 = arith.constant 0 : index
    %c0_51 = arith.constant 0 : index
    %170 = vector.load %arg4[%c0_50, %c0_51] : memref<1x512xf32, #tpu.memory_space<vmem>>, vector<1x512xf32>
    %171 = vector.broadcast %170 : vector<1x512xf32> to vector<8x512xf32>
    %172 = arith.addf %169, %171 : vector<8x512xf32>
    %173 = vector.extract_strided_slice %172 {offsets = [0, 64], sizes = [8, 64], strides = [1, 1]} : vector<8x512xf32> to vector<8x64xf32>
    %174 = arith.negf %173 : vector<8x64xf32>
    %175 = math.exp %174 : vector<8x64xf32>
    %cst_52 = arith.constant 1.000000e+00 : f32
    %176 = vector.broadcast %cst_52 : f32 to vector<8x64xf32>
    %177 = arith.addf %176, %175 : vector<8x64xf32>
    %178 = arith.divf %176, %177 : vector<8x64xf32>
    %179 = vector.extract_strided_slice %172 {offsets = [0, 192], sizes = [8, 64], strides = [1, 1]} : vector<8x512xf32> to vector<8x64xf32>
    %180 = arith.negf %179 : vector<8x64xf32>
    %181 = math.exp %180 : vector<8x64xf32>
    %cst_53 = arith.constant 1.000000e+00 : f32
    %182 = vector.broadcast %cst_53 : f32 to vector<8x64xf32>
    %183 = arith.addf %182, %181 : vector<8x64xf32>
    %184 = arith.divf %182, %183 : vector<8x64xf32>
    %185 = vector.extract_strided_slice %172 {offsets = [0, 320], sizes = [8, 64], strides = [1, 1]} : vector<8x512xf32> to vector<8x64xf32>
    %186 = arith.negf %185 : vector<8x64xf32>
    %187 = math.exp %186 : vector<8x64xf32>
    %cst_54 = arith.constant 1.000000e+00 : f32
    %188 = vector.broadcast %cst_54 : f32 to vector<8x64xf32>
    %189 = arith.addf %188, %187 : vector<8x64xf32>
    %190 = arith.divf %188, %189 : vector<8x64xf32>
    %191 = vector.extract_strided_slice %172 {offsets = [0, 448], sizes = [8, 64], strides = [1, 1]} : vector<8x512xf32> to vector<8x64xf32>
    %192 = math.tanh %191 : vector<8x64xf32>
    %193 = vector.extract_strided_slice %165 {offsets = [0, 64], sizes = [8, 64], strides = [1, 1]} : vector<8x128xf32> to vector<8x64xf32>
    %194 = arith.mulf %184, %193 : vector<8x64xf32>
    %195 = arith.mulf %178, %192 : vector<8x64xf32>
    %196 = arith.addf %194, %195 : vector<8x64xf32>
    %197 = math.tanh %196 : vector<8x64xf32>
    %198 = arith.mulf %190, %197 : vector<8x64xf32>
    %c0_55 = arith.constant 0 : index
    %c0_56 = arith.constant 0 : index
    %199 = vector.load %arg5[%c0_55, %c0_56] : memref<1x64xf32, #tpu.memory_space<vmem>>, vector<1x64xf32>
    %200 = vector.broadcast %199 : vector<1x64xf32> to vector<8x64xf32>
    %201 = arith.mulf %198, %200 : vector<8x64xf32>
    %cst_57 = arith.constant dense<0.000000e+00> : vector<8xf32>
    %202 = vector.multi_reduction <add>, %201, %cst_57 [1] : vector<8x64xf32> to vector<8xf32>
    %203 = vector.shape_cast %202 : vector<8xf32> to vector<8x1xf32>
    %c0_58 = arith.constant 0 : index
    %c0_59 = arith.constant 0 : index
    %204 = vector.load %arg6[%c0_58, %c0_59] : memref<1x1xf32, #tpu.memory_space<vmem>>, vector<1x1xf32>
    %205 = vector.broadcast %204 : vector<1x1xf32> to vector<8x1xf32>
    %206 = arith.addf %203, %205 : vector<8x1xf32>
    %207 = vector.shape_cast %206 : vector<8x1xf32> to vector<8x1xf32>
    %208 = vector.broadcast %207 : vector<8x1xf32> to vector<8x128xf32>
    %c0_60 = arith.constant 0 : index
    %c0_61 = arith.constant 0 : index
    %209 = vector.load %arg7[%c0_60, %c0_61] : memref<8x128xf32, #tpu.memory_space<vmem>>, vector<8x128xf32>
    tpu.vector_store %arg7[%c0_60, %c0_61], %208 {strides = array<i32>} : memref<8x128xf32, #tpu.memory_space<vmem>>, vector<8x128xf32>,
    return
  }
  func.func @transform_0(%arg0: i32) -> (i32, i32) {
    %c0_i32 = arith.constant 0 : i32
    %c0_i32_0 = arith.constant 0 : i32
    %c0_i32_1 = arith.constant 0 : i32
    return %c0_i32, %c0_i32_0 : i32, i32
  }
  func.func @transform_1(%arg0: i32) -> (i32, i32) {
    %c0_i32 = arith.constant 0 : i32
    %c0_i32_0 = arith.constant 0 : i32
    %c0_i32_1 = arith.constant 0 : i32
    return %c0_i32, %c0_i32_0 : i32, i32
  }
  func.func @transform_2(%arg0: i32) -> (i32, i32) {
    %c0_i32 = arith.constant 0 : i32
    %c0_i32_0 = arith.constant 0 : i32
    %c0_i32_1 = arith.constant 0 : i32
    return %c0_i32, %c0_i32_0 : i32, i32
  }
  func.func @transform_3(%arg0: i32) -> (i32, i32) {
    %c0_i32 = arith.constant 0 : i32
    %c0_i32_0 = arith.constant 0 : i32
    %c0_i32_1 = arith.constant 0 : i32
    return %c0_i32, %c0_i32_0 : i32, i32
  }
  func.func @transform_4(%arg0: i32) -> (i32, i32) {
    %c0_i32 = arith.constant 0 : i32
    %c0_i32_0 = arith.constant 0 : i32
    %c0_i32_1 = arith.constant 0 : i32
    return %c0_i32, %c0_i32_0 : i32, i32
  }
  func.func @transform_5(%arg0: i32) -> (i32, i32) {
    %c0_i32 = arith.constant 0 : i32
    %c0_i32_0 = arith.constant 0 : i32
    %c0_i32_1 = arith.constant 0 : i32
    return %c0_i32, %c0_i32_0 : i32, i32
  }
  func.func @transform_6(%arg0: i32) -> (i32, i32) {
    %c0_i32 = arith.constant 0 : i32
    %c0_i32_0 = arith.constant 0 : i32
    %c0_i32_1 = arith.constant 0 : i32
    return %c0_i32, %c0_i32_0 : i32, i32
  }
}

</mosaic_0001>

<bundles_post_ra>
// kernel: lstm_regressor_forward.1
= control target key start
LH: loop header
LB: loop body
LE: loop exit
PB: predicated region body
PF: predicated region fallthrough
CT: control target
= control target key end

     0   :  { %s3236_s0 = inlined_call_operand.vmem [shape: f32[64,16], index: 0, kind: input, shape index: {}]   ;;  %s3237_s1 = inlined_call_operand.vmem [shape: f32[16,512], index: 1, kind: input, shape index: {}]   ;;  %s3238_s2 = inlined_call_operand.hbm [shape: f32[128,512], index: 2, kind: input, shape index: {}]   ;;  %s3239_s3 = inlined_call_operand.vmem [shape: f32[1,512], index: 3, kind: input, shape index: {}]   ;;  %s3240_s4 = inlined_call_operand.vmem [shape: f32[1,64], index: 4, kind: input, shape index: {}]   ;;  %s3241_s5 = inlined_call_operand.<no memory space> [shape: f32[1,1], index: 5, kind: input, shape index: {}]   ;;  %s3242_s6 = inlined_call_operand.vmem [shape: f32[8,128], index: 6, kind: output, shape index: {}]  }
   0x1   :  { %v11_v0 = vstv %s3241_s5 }
   0x2   :  { %12 = vst [vmem:[#allocation3] sm:$0x1] %v11_v0 }
   0x3   :  { %13 = vsyncpa [#allocation5], 0  ;;  %s2140_s23 = smov [#allocation4]  }
   0x4   :  { %s23_s24 = sshll.u32 %s2140_s23, 4  ;;  %s24_s24 = int_to_ptr.vmem [resolvable:$true] %s23_s24 }
   0x5   :  { %s2126_s25 = scalar_lea.vmem %s24_s24, 8192  ;;  %p2131_p1 = scmp.lt.s32.totalorder %s24_s24, %s24_s24 }
   0x6   :  { %p2127_p0 = scmp.ne.s32.totalorder %s24_s24, %s2126_s25  ;;  %p2132_p2 = scmp.lt.s32.totalorder %s2126_s25, %s2126_s25 }
   0x8   :  { %p2133_p3 = por %p2132_p2, %p2131_p1 }
   0xa   :  { %p2134_p4 = pnand %p2133_p3, %p2127_p0 }
   0xc   :  { %2137 = shalt.err (!%p2134_p4)
}
   0xd   :  { %s2141_s26 = smov 512   ;;  %s2142_s27 = smov 32  }
   0xe   :  { %29 = dma.hbm_to_vmem [thread:$0]  %s3238_s2, 8192, %s24_s24, [#allocation5], %s2141_s26, %s2141_s26, %s2142_s27  }
   0xf   :  { %2138 = dma.done.wait [#allocation5], 8192  }
  0x10   :  { %2139 = vsyncadd [#allocation5], 4294959104  ;;  %v3245_v1 = vmov 0.0   ;;  %v52_v2 = vld [vmem:[%s3237_s1 + $0x28] sm:$0xff]  ;;  %v51_v3 = vld [vmem:[%s3237_s1 + $0x20] sm:$0xff]  ;;  %vm77_vm0 = vcmask 130048  }
  0x11   :  { %166 = vmatprep.mubr.f32.mxu0 %v3245_v1  ;;  %279 = vmatprep.mubr.f32.mxu1 %v3245_v1  ;;  %v48_v4 = vld [vmem:[%s3237_s1 + $0x8] sm:$0xff]  ;;  %v47_v5 = vld [vmem:[%s3237_s1] sm:$0xff]  ;;  %v54_v7 = vld [vmem:[%s3237_s1 + $0x38] sm:$0xff]  ;;  %vm379_vm1 = vcmask 523264   ;;  %s2144_s12 = smov 64  }
  0x12   :  { %130 = vmatprep.subr.mxu0 %v52_v2  ;;  %v39_v6 = vld [vmem:[%s3236_s0] sm:$0xff]  ;;  %243 = vmatprep.subr.mxu1 %v54_v7  ;;  %v53_v8 = vld [vmem:[%s3237_s1 + $0x30] sm:$0xff]  ;;  %v50_v9 = vld [vmem:[%s3237_s1 + $0x18] sm:$0xff] }
  0x13   :  { %131 = vmatpush1.msra.mxu0 %v51_v3  ;;  %v49_v10 = vld [vmem:[%s3237_s1 + $0x10] sm:$0xff]  ;;  %244 = vmatpush1.msra.mxu1 %v53_v8  ;;  %v2222_v12 = vld [vmem:[#allocation4 + $0x1f8] sm:$0xff]  ;;  %v2225_v13 = vld [vmem:[#allocation4 + $0x1e0] sm:$0xff] }
  0x14   :  { %132 = vmatprep.subr.mxu0 %v48_v4  ;;  %245 = vmatprep.subr.mxu1 %v50_v9  ;;  %v2220_v11 = vld [vmem:[#allocation4 + $0x1e8] sm:$0xff]  ;;  %3360 = vst [vmem:[#allocation8_spill] sm:$0xff] %v2222_v12  ;;  %v2228_v14 = vld [vmem:[#allocation4 + $0x1f0] sm:$0xff]  ;;  %v2237_v17 = vld [vmem:[#allocation4 + $0x1c0] sm:$0xff] }
  0x15   :  { %133 = vmatpush1.msra.mxu0 %v47_v5  ;;  %246 = vmatpush1.msra.mxu1 %v49_v10  ;;  %3359 = vst [vmem:[#allocation7_spill] sm:$0xff] %v2220_v11  ;;  %v2231_v15 = vld [vmem:[#allocation4 + $0x1c8] sm:$0xff]  ;;  %v2241_v18 = vld [vmem:[#allocation4 + $0x1d8] sm:$0xff]  ;;  %v2245_v20 = vld [vmem:[#allocation4 + $0x1d0] sm:$0xff] }
  0x16   :  { %1860 = vmatmul.mubr.msk.f32.vlgmr.msra.gmra.mxu0 %vm77_vm0, %v39_v6  ;;  %1868 = vmatmul.mubr.msk.f32.vlgmr.msra.gmra.mxu1 %vm77_vm0, %v39_v6  ;;  %v40_v16 = vld [vmem:[%s3236_s0 + $0x8] sm:$0xff]  ;;  %v2251_v22 = vld [vmem:[#allocation4 + $0x1b8] sm:$0xff]  ;;  %v2257_v24 = vld [vmem:[#allocation4 + $0x1b0] sm:$0xff] }
  0x17   :  { %172 = vmatprep.mubr.f32.mxu0 %v3245_v1  ;;  %285 = vmatprep.mubr.f32.mxu1 %v3245_v1  ;;  %v2243_v19 = vld [vmem:[#allocation4 + $0x1a8] sm:$0xff]  ;;  %v2249_v21 = vld [vmem:[#allocation4 + $0x1a0] sm:$0xff]  ;;  %v2264_v26 = vld [vmem:[#allocation4 + $0x198] sm:$0xff] }
  0x18   :  { %450 = vmatprep.subr.mxu0 %v2220_v11  ;;  %521 = vmatprep.subr.mxu1 %v2222_v12  ;;  %v2255_v23 = vld [vmem:[#allocation4 + $0x188] sm:$0xff]  ;;  %v2268_v27 = vld [vmem:[#allocation4 + $0x180] sm:$0xff]  ;;  %v2274_v29 = vld [vmem:[#allocation4 + $0x190] sm:$0xff] }
  0x19   :  { %451 = vmatpush1.msra.mxu0 %v2225_v13  ;;  %522 = vmatpush1.msra.mxu1 %v2228_v14  ;;  %v41_v25 = vld [vmem:[%s3236_s0 + $0x10] sm:$0xff]  ;;  %v2278_v30 = vld [vmem:[#allocation4 + $0x160] sm:$0xff]  ;;  %v2282_v31 = vld [vmem:[#allocation4 + $0x178] sm:$0xff] }
  0x1a   :  { %452 = vmatprep.subr.mxu0 %v2231_v15  ;;  %1861 = vmatmul.mubr.msk.f32.gmra.mxu0 %vm77_vm0, %v40_v16  ;;  %v2272_v28 = vld [vmem:[#allocation4 + $0x168] sm:$0xff]  ;;  %v2288_v33 = vld [vmem:[#allocation4 + $0x170] sm:$0xff]  ;;  %v2295_v35 = vld [vmem:[#allocation4 + $0x158] sm:$0xff] }
  0x1b   :  { %453 = vmatpush1.msra.mxu0 %v2237_v17  ;;  %523 = vmatprep.subr.mxu1 %v2241_v18  ;;  %v2286_v32 = vld [vmem:[#allocation4 + $0x148] sm:$0xff]  ;;  %v42_v34 = vld [vmem:[%s3236_s0 + $0x18] sm:$0xff]  ;;  %v2299_v36 = vld [vmem:[#allocation4 + $0x140] sm:$0xff] }
  0x1c   :  { %454 = vmatprep.subr.mxu0 %v2243_v19  ;;  %524 = vmatpush1.msra.mxu1 %v2245_v20  ;;  %v2303_v37 = vld [vmem:[#allocation4 + $0x128] sm:$0xff]  ;;  %v2305_v38 = vld [vmem:[#allocation4 + $0x150] sm:$0xff]  ;;  %v2309_v39 = vld [vmem:[#allocation4 + $0x120] sm:$0xff] }
  0x1d   :  { %1869 = vmatmul.mubr.msk.f32.gmra.mxu1 %vm77_vm0, %v40_v16  ;;  %455 = vmatpush1.msra.mxu0 %v2249_v21  ;;  %v2313_v40 = vld [vmem:[#allocation4 + $0x138] sm:$0xff]  ;;  %v2317_v41 = vld [vmem:[#allocation4 + $0x108] sm:$0xff]  ;;  %v2319_v42 = vld [vmem:[#allocation4 + $0x130] sm:$0xff] }
  0x1e   :  { %525 = vmatprep.subr.mxu1 %v2251_v22  ;;  %178 = vmatprep.mubr.f32.mxu0 %v3245_v1  ;;  %v43_v43 = vld [vmem:[%s3236_s0 + $0x20] sm:$0xff]  ;;  %v2334_v46 = vld [vmem:[#allocation4 + $0xe8] sm:$0xff]  ;;  %v2336_v47 = vld [vmem:[#allocation4 + $0x110] sm:$0xff] }
  0x1f   :  { %456 = vmatprep.subr.mxu0 %v2255_v23  ;;  %526 = vmatpush1.msra.mxu1 %v2257_v24  ;;  %v2326_v44 = vld [vmem:[#allocation4 + $0x118] sm:$0xff]  ;;  %v2330_v45 = vld [vmem:[#allocation4 + $0x100] sm:$0xff]  ;;  %v2348_v50 = vld [vmem:[#allocation4 + $0xc8] sm:$0xff] }
  0x20   :  { %1862 = vmatmul.mubr.msk.f32.gmra.mxu0 %vm77_vm0, %v41_v25  ;;  %527 = vmatprep.subr.mxu1 %v2264_v26  ;;  %v2340_v48 = vld [vmem:[#allocation4 + $0xe0] sm:$0xff]  ;;  %v2344_v49 = vld [vmem:[#allocation4 + $0xf8] sm:$0xff]  ;;  %v2350_v51 = vld [vmem:[#allocation4 + $0xf0] sm:$0xff] }
  0x21   :  { %457 = vmatpush1.msra.mxu0 %v2268_v27  ;;  %291 = vmatprep.mubr.f32.mxu1 %v3245_v1  ;;  %v44_v52 = vld [vmem:[%s3236_s0 + $0x28] sm:$0xff]  ;;  %v2357_v53 = vld [vmem:[#allocation4 + $0xd8] sm:$0xff]  ;;  %v2367_v56 = vld [vmem:[#allocation4 + $0xd0] sm:$0xff] }
  0x22   :  { %458 = vmatprep.subr.mxu0 %v2272_v28  ;;  %528 = vmatpush1.msra.mxu1 %v2274_v29  ;;  %v2361_v54 = vld [vmem:[#allocation4 + $0xc0] sm:$0xff]  ;;  %v2365_v55 = vld [vmem:[#allocation4 + $0xa8] sm:$0xff]  ;;  %v2375_v58 = vld [vmem:[#allocation4 + $0xb8] sm:$0xff] }
  0x23   :  { %1870 = vmatmul.mubr.msk.f32.gmra.mxu1 %vm77_vm0, %v41_v25  ;;  %459 = vmatpush1.msra.mxu0 %v2278_v30  ;;  %v2371_v57 = vld [vmem:[#allocation4 + $0xa0] sm:$0xff]  ;;  %v2379_v59 = vld [vmem:[#allocation4 + $0x88] sm:$0xff]  ;;  %v2381_v60 = vld [vmem:[#allocation4 + $0xb0] sm:$0xff] }
  0x24   :  { %529 = vmatprep.subr.mxu1 %v2282_v31  ;;  %184 = vmatprep.mubr.f32.mxu0 %v3245_v1  ;;  %3361 = vst [vmem:[#allocation9_spill] sm:$0xff] %v2379_v59  ;;  %3362 = vst [vmem:[#allocation10_spill] sm:$0xff] %v2381_v60  ;;  %v45_v61 = vld [vmem:[%s3236_s0 + $0x30] sm:$0xff]  ;;  %v2388_v62 = vld [vmem:[#allocation4 + $0x98] sm:$0xff] }
  0x25   :  { %460 = vmatprep.subr.mxu0 %v2286_v32  ;;  %530 = vmatpush1.msra.mxu1 %v2288_v33  ;;  %3363 = vst [vmem:[#allocation11_spill] sm:$0xff] %v2388_v62  ;;  %v2392_v63 = vld [vmem:[#allocation4 + $0x80] sm:$0xff]  ;;  %v2396_v0 = vld [vmem:[#allocation4 + $0x68] sm:$0xff]  ;;  %v2398_v2 = vld [vmem:[#allocation4 + $0x90] sm:$0xff] }
  0x26   :  { %1863 = vmatmul.mubr.msk.f32.gmra.mxu0 %vm77_vm0, %v42_v34  ;;  %531 = vmatprep.subr.mxu1 %v2295_v35  ;;  %3364 = vst [vmem:[#allocation12_spill] sm:$0xff] %v2392_v63  ;;  %3365 = vst [vmem:[#allocation13_spill] sm:$0xff] %v2396_v0  ;;  %v2402_v3 = vld [vmem:[#allocation4 + $0x60] sm:$0xff]  ;;  %v2406_v4 = vld [vmem:[#allocation4 + $0x78] sm:$0xff] }
  0x27   :  { %461 = vmatpush1.msra.mxu0 %v2299_v36  ;;  %297 = vmatprep.mubr.f32.mxu1 %v3245_v1  ;;  %3366 = vst [vmem:[#allocation14_spill] sm:$0xff] %v2398_v2  ;;  %3367 = vst [vmem:[#allocation15_spill] sm:$0xff] %v2402_v3  ;;  %v2410_v5 = vld [vmem:[#allocation4 + $0x48] sm:$0xff]  ;;  %v2412_v6 = vld [vmem:[#allocation4 + $0x70] sm:$0xff] }
  0x28   :  { %462 = vmatprep.subr.mxu0 %v2303_v37  ;;  %532 = vmatpush1.msra.mxu1 %v2305_v38  ;;  %3368 = vst [vmem:[#allocation16_spill] sm:$0xff] %v2406_v4  ;;  %3369 = vst [vmem:[#allocation17_spill] sm:$0xff] %v2410_v5  ;;  %v46_v7 = vld [vmem:[%s3236_s0 + $0x38] sm:$0xff]  ;;  %v2423_v9 = vld [vmem:[#allocation4 + $0x40] sm:$0xff] }
  0x29   :  { %1871 = vmatmul.mubr.msk.f32.gmra.mxu1 %vm77_vm0, %v42_v34  ;;  %463 = vmatpush1.msra.mxu0 %v2309_v39  ;;  %3370 = vst [vmem:[#allocation18_spill] sm:$0xff] %v2412_v6  ;;  %v2419_v8 = vld [vmem:[#allocation4 + $0x58] sm:$0xff]  ;;  %3372 = vst [vmem:[#allocation20_spill] sm:$0xff] %v2423_v9  ;;  %v2427_v10 = vld [vmem:[#allocation4 + $0x28] sm:$0xff] }
  0x2a   :  { %533 = vmatprep.subr.mxu1 %v2313_v40  ;;  %190 = vmatprep.mubr.f32.mxu0 %v3245_v1  ;;  %3371 = vst [vmem:[#allocation19_spill] sm:$0xff] %v2419_v8  ;;  %3373 = vst [vmem:[#allocation21_spill] sm:$0xff] %v2427_v10  ;;  %v2429_v16 = vld [vmem:[#allocation4 + $0x50] sm:$0xff]  ;;  %v2433_v25 = vld [vmem:[#allocation4 + $0x20] sm:$0xff] }
  0x2b   :  { %464 = vmatprep.subr.mxu0 %v2317_v41  ;;  %534 = vmatpush1.msra.mxu1 %v2319_v42  ;;  %3374 = vst [vmem:[#allocation22_spill] sm:$0xff] %v2429_v16  ;;  %3375 = vst [vmem:[#allocation23_spill] sm:$0xff] %v2433_v25  ;;  %v2437_v34 = vld [vmem:[#allocation4 + $0x38] sm:$0xff] }
  0x2c   :  { %1864 = vmatmul.mubr.msk.f32.gmra.mxu0 %vm77_vm0, %v43_v43  ;;  %535 = vmatprep.subr.mxu1 %v2326_v44  ;;  %3376 = vst [vmem:[#allocation24_spill] sm:$0xff] %v2437_v34 }
  0x2d   :  { %465 = vmatpush1.msra.mxu0 %v2330_v45  ;;  %303 = vmatprep.mubr.f32.mxu1 %v3245_v1 }
  0x2e   :  { %466 = vmatprep.subr.mxu0 %v2334_v46  ;;  %536 = vmatpush1.msra.mxu1 %v2336_v47 }
  0x2f   :  { %1872 = vmatmul.mubr.msk.f32.gmra.mxu1 %vm77_vm0, %v43_v43  ;;  %467 = vmatpush1.msra.mxu0 %v2340_v48  ;;  %v2439_v43 = vld [vmem:[#allocation4 + $0x8] sm:$0xff] }
  0x30   :  { %537 = vmatprep.subr.mxu1 %v2344_v49  ;;  %196 = vmatprep.mubr.f32.mxu0 %v3245_v1  ;;  %3377 = vst [vmem:[#allocation25_spill] sm:$0xff] %v2439_v43 }
  0x31   :  { %468 = vmatprep.subr.mxu0 %v2348_v50  ;;  %538 = vmatpush1.msra.mxu1 %v2350_v51 }
  0x32   :  { %1865 = vmatmul.mubr.msk.f32.gmra.mxu0 %vm77_vm0, %v44_v52  ;;  %539 = vmatprep.subr.mxu1 %v2357_v53 }
  0x33   :  { %469 = vmatpush1.msra.mxu0 %v2361_v54  ;;  %309 = vmatprep.mubr.f32.mxu1 %v3245_v1 }
  0x34   :  { %470 = vmatprep.subr.mxu0 %v2365_v55  ;;  %540 = vmatpush1.msra.mxu1 %v2367_v56 }
  0x35   :  { %1873 = vmatmul.mubr.msk.f32.gmra.mxu1 %vm77_vm0, %v44_v52  ;;  %471 = vmatpush1.msra.mxu0 %v2371_v57  ;;  %v2443_v52 = vld [vmem:[#allocation4 + $0x30] sm:$0xff] }
  0x36   :  { %541 = vmatprep.subr.mxu1 %v2375_v58  ;;  %202 = vmatprep.mubr.f32.mxu0 %v3245_v1  ;;  %3378 = vst [vmem:[#allocation26_spill] sm:$0xff] %v2443_v52 }
  0x37   :  { %472 = vmatprep.subr.mxu0 %v2379_v59  ;;  %542 = vmatpush1.msra.mxu1 %v2381_v60 }
  0x38   :  { %1866 = vmatmul.mubr.msk.f32.gmra.mxu0 %vm77_vm0, %v45_v61  ;;  %543 = vmatprep.subr.mxu1 %v2388_v62 }
  0x39   :  { %473 = vmatpush1.msra.mxu0 %v2392_v63  ;;  %315 = vmatprep.mubr.f32.mxu1 %v3245_v1 }
  0x3a   :  { %474 = vmatprep.subr.mxu0 %v2396_v0  ;;  %544 = vmatpush1.msra.mxu1 %v2398_v2 }
  0x3b   :  { %1874 = vmatmul.mubr.msk.f32.gmra.mxu1 %vm77_vm0, %v45_v61  ;;  %475 = vmatpush1.msra.mxu0 %v2402_v3  ;;  %v2445_v61 = vld [vmem:[#allocation4] sm:$0xff] }
  0x3c   :  { %545 = vmatprep.subr.mxu1 %v2406_v4  ;;  %208 = vmatprep.mubr.f32.mxu0 %v3245_v1  ;;  %3379 = vst [vmem:[#allocation27_spill] sm:$0xff] %v2445_v61 }
  0x3d   :  { %476 = vmatprep.subr.mxu0 %v2410_v5  ;;  %546 = vmatpush1.msra.mxu1 %v2412_v6 }
  0x3e   :  { %1867 = vmatmul.mubr.msk.f32.gmra.mxu0 %vm77_vm0, %v46_v7  ;;  %547 = vmatprep.subr.mxu1 %v2419_v8  ;;  %v2449_v8 = vld [vmem:[#allocation4 + $0x18] sm:$0xff] }
  0x3f   :  { %477 = vmatpush1.msra.mxu0 %v2423_v9  ;;  %321 = vmatprep.mubr.f32.mxu1 %v3245_v1  ;;  %3380 = vst [vmem:[#allocation28_spill] sm:$0xff] %v2449_v8  ;;  %v2453_v1 = vld [vmem:[#allocation4 + $0x10] sm:$0xff] }
  0x40   :  { %478 = vmatprep.subr.mxu0 %v2427_v10  ;;  %548 = vmatpush1.msra.mxu1 %v2429_v16  ;;  %3381 = vst [vmem:[#allocation29_spill] sm:$0xff] %v2453_v1  ;;  %v3382_v10 = vmov 0.0  }
  0x41   :  { %1875 = vmatmul.mubr.msk.f32.gmra.mxu1 %vm77_vm0, %v46_v7  ;;  %479 = vmatpush1.msra.mxu0 %v2433_v25  ;;  %v57_v7 = vlaneseq }
  0x42   :  { %549 = vmatprep.subr.mxu1 %v2437_v34  ;;  %480 = vmatprep.subr.mxu0 %v2439_v43 }
  0x43   :  { %550 = vmatpush1.msra.mxu1 %v2443_v52  ;;  %481 = vmatpush1.msra.mxu0 %v2445_v61  ;;  %v2463_v43 = vshrl.u32 %v57_v7, 7  ;;  %v2469_v61 = vld [vmem:[%s3239_s3] sm:$0xf] }
  0x44   :  { %551 = vmatprep.subr.mxu1 %v2449_v8  ;;  %514 = vmatprep.mubr.f32.mxu0 %v3382_v10  ;;  %3384 = vst [vmem:[#allocation31_spill] sm:$0xff] %v2469_v61 }
  0x45   :  { %552 = vmatpush1.msra.mxu1 %v2453_v1  ;;  %585 = vmatprep.mubr.f32.mxu1 %v3382_v10  ;;  %3383 = vst [vmem:[#allocation30_spill] sm:$0xff] %v2463_v43  ;;  %v3272_v25 = vsub.s32 0, %v2463_v43  ;;  %v3277_v10 = vsub.s32 2, %v2463_v43  ;;  %v3282_v9 = vsub.s32 3, %v2463_v43 }
  0x46   :  { %620 = vmatprep.subr.mxu0 %v2220_v11  ;;  %691 = vmatprep.subr.mxu1 %v2222_v12 }
  0x47   :  { %v2474_v1 = vrot.slane %v2469_v61, %v3272_v25  ;;  %v2481_v52 = vrot.slane %v2469_v61, %v3277_v10  ;;  %v2488_v5 = vrot.slane %v2469_v61, %v3282_v9 }
  0x49   :  { %3385 = vst [vmem:[#allocation32_spill] sm:$0xff] %v2474_v1  ;;  %3386 = vst [vmem:[#allocation33_spill] sm:$0xff] %v2481_v52 }
  0xd6   :  { %v168_v11 = vpop.f32.mrf.mxu0  ;;  %v281_v34 = vpop.f32.mrf.mxu1 }
  0xd7   :  { %v169_v12 = vadd.f32 %v168_v11, %v2474_v1  ;;  %v282_v16 = vadd.f32 %v281_v34, %v2481_v52 }
  0xd8   :  { %v170_v8 = vpop.f32.mrf.mxu0  ;;  %v283_v11 = vpop.f32.mrf.mxu1 }
  0xd9   :  { %v1876_v7 = vmul.f32 -1.442695, %v169_v12  ;;  %v1877_v25 = vmul.f32 -1.442695, %v282_v16  ;;  %v284_v12 = vadd.f32 %v283_v11, %v2488_v5  ;;  %v3393_v11 = vld [vmem:[#allocation24_spill] sm:$0xff] }
  0xdb   :  { %1914 = vpow2.f32 %v1876_v7 }
  0xdc   :  { %1916 = vpow2.f32 %v1877_v25  ;;  %v3391_v25 = vld [vmem:[#allocation22_spill] sm:$0xff] }
  0xdd   :  { %1918 = vtanh.f32 %v284_v12  ;;  %v3394_v12 = vld [vmem:[#allocation23_spill] sm:$0xff] }
  0xe8   :  { %v1915_v8 = vpop.eup %1914 }
  0xe9   :  { %v366_v1 = vadd.f32 1.0, %v1915_v8  ;;  %v1917_v7 = vpop.eup %1916  ;;  %v3395_v8 = vld [vmem:[#allocation26_spill] sm:$0xff] }
  0xea   :  { %v372_v10 = vadd.f32 1.0, %v1917_v7  ;;  %v1919_v6 = vpop.eup %1918  ;;  %v3396_v7 = vld [vmem:[#allocation25_spill] sm:$0xff] }
  0xeb   :  { %1920 = vrcp.f32 %v366_v1  ;;  %v3387_v1 = vld [vmem:[#allocation18_spill] sm:$0xff] }
  0xec   :  { %1922 = vrcp.f32 %v372_v10  ;;  %v3390_v10 = vld [vmem:[#allocation20_spill] sm:$0xff] }
  0xf8   :  { %v1921_v34 = vpop.eup %1920 }
  0xf9   :  { %v2491_v52 = vmul.f32 %v1921_v34, %v1919_v6  ;;  %v1923_v16 = vpop.eup %1922  ;;  %v3388_v6 = vld [vmem:[#allocation17_spill] sm:$0xff]  ;;  %v3397_v34 = vld [vmem:[#allocation28_spill] sm:$0xff] }
  0xfb   :  { %1924 = vtanh.f32 %v2491_v52 }
 0x108   :  { %v1925_v9 = vpop.eup %1924 }
 0x109   :  { %v378_v61 = vmul.f32 %v1925_v9, %v1923_v16  ;;  %v3389_v9 = vld [vmem:[#allocation19_spill] sm:$0xff] }
 0x10a   :  { %v3398_v16 = vld [vmem:[#allocation27_spill] sm:$0xff] }
 0x10b   :  { %1878 = vmatmul.mubr.msk.f32.vlgmr.msra.gmra.mxu0 %vm379_vm1, %v378_v61  ;;  %1879 = vmatmul.mubr.msk.f32.vlgmr.msra.gmra.mxu1 %vm379_vm1, %v378_v61  ;;  %v3392_v61 = vld [vmem:[#allocation21_spill] sm:$0xff] }
 0x10c   :  { %621 = vmatpush1.msra.mxu0 %v2225_v13  ;;  %692 = vmatpush1.msra.mxu1 %v2228_v14 }
 0x10d   :  { %622 = vmatprep.subr.mxu0 %v2231_v15  ;;  %693 = vmatprep.subr.mxu1 %v2241_v18 }
 0x10e   :  { %623 = vmatpush1.msra.mxu0 %v2237_v17  ;;  %694 = vmatpush1.msra.mxu1 %v2245_v20 }
 0x10f   :  { %624 = vmatprep.subr.mxu0 %v2243_v19  ;;  %695 = vmatprep.subr.mxu1 %v2251_v22 }
 0x110   :  { %625 = vmatpush1.msra.mxu0 %v2249_v21  ;;  %696 = vmatpush1.msra.mxu1 %v2257_v24 }
 0x111   :  { %626 = vmatprep.subr.mxu0 %v2255_v23  ;;  %697 = vmatprep.subr.mxu1 %v2264_v26 }
 0x112   :  { %627 = vmatpush1.msra.mxu0 %v2268_v27  ;;  %698 = vmatpush1.msra.mxu1 %v2274_v29 }
 0x113   :  { %628 = vmatprep.subr.mxu0 %v2272_v28  ;;  %699 = vmatprep.subr.mxu1 %v2282_v31 }
 0x114   :  { %629 = vmatpush1.msra.mxu0 %v2278_v30  ;;  %700 = vmatpush1.msra.mxu1 %v2288_v33 }
 0x115   :  { %630 = vmatprep.subr.mxu0 %v2286_v32  ;;  %701 = vmatprep.subr.mxu1 %v2295_v35 }
 0x116   :  { %631 = vmatpush1.msra.mxu0 %v2299_v36  ;;  %702 = vmatpush1.msra.mxu1 %v2305_v38 }
 0x117   :  { %632 = vmatprep.subr.mxu0 %v2303_v37  ;;  %703 = vmatprep.subr.mxu1 %v2313_v40 }
 0x118   :  { %633 = vmatpush1.msra.mxu0 %v2309_v39  ;;  %704 = vmatpush1.msra.mxu1 %v2319_v42 }
 0x119   :  { %634 = vmatprep.subr.mxu0 %v2317_v41  ;;  %705 = vmatprep.subr.mxu1 %v2326_v44 }
 0x11a   :  { %635 = vmatpush1.msra.mxu0 %v2330_v45  ;;  %706 = vmatpush1.msra.mxu1 %v2336_v47 }
 0x11b   :  { %636 = vmatprep.subr.mxu0 %v2334_v46  ;;  %707 = vmatprep.subr.mxu1 %v2344_v49 }
 0x11c   :  { %637 = vmatpush1.msra.mxu0 %v2340_v48  ;;  %708 = vmatpush1.msra.mxu1 %v2350_v51 }
 0x11d   :  { %638 = vmatprep.subr.mxu0 %v2348_v50  ;;  %709 = vmatprep.subr.mxu1 %v2357_v53 }
 0x11e   :  { %639 = vmatpush1.msra.mxu0 %v2361_v54  ;;  %710 = vmatpush1.msra.mxu1 %v2367_v56 }
 0x11f   :  { %640 = vmatprep.subr.mxu0 %v2365_v55  ;;  %711 = vmatprep.subr.mxu1 %v2375_v58 }
 0x120   :  { %641 = vmatpush1.msra.mxu0 %v2371_v57  ;;  %712 = vmatpush1.msra.mxu1 %v2381_v60 }
 0x121   :  { %642 = vmatprep.subr.mxu0 %v2379_v59  ;;  %713 = vmatprep.subr.mxu1 %v2388_v62 }
 0x122   :  { %643 = vmatpush1.msra.mxu0 %v2392_v63  ;;  %714 = vmatpush1.msra.mxu1 %v2398_v2 }
 0x123   :  { %644 = vmatprep.subr.mxu0 %v2396_v0  ;;  %715 = vmatprep.subr.mxu1 %v2406_v4 }
 0x124   :  { %645 = vmatpush1.msra.mxu0 %v2402_v3  ;;  %716 = vmatpush1.msra.mxu1 %v3387_v1 }
 0x125   :  { %646 = vmatprep.subr.mxu0 %v3388_v6  ;;  %717 = vmatprep.subr.mxu1 %v3389_v9  ;;  %v3399_v6 = vmov 0.0   ;;  %v3400_v9 = vld [vmem:[#allocation29_spill] sm:$0xff] }
 0x126   :  { %647 = vmatpush1.msra.mxu0 %v3390_v10  ;;  %718 = vmatpush1.msra.mxu1 %v3391_v25  ;;  %v3401_v25 = vld [vmem:[#allocation7_spill] sm:$0xff] }
 0x127   :  { %648 = vmatprep.subr.mxu0 %v3392_v61  ;;  %719 = vmatprep.subr.mxu1 %v3393_v11  ;;  %v3402_v61 = vld [vmem:[#allocation8_spill] sm:$0xff]  ;;  %v174_v11 = vpop.f32.mrf.mxu0 }
 0x128   :  { %649 = vmatpush1.msra.mxu0 %v3394_v12  ;;  %720 = vmatpush1.msra.mxu1 %v3395_v8  ;;  %v3289_v8 = vsub.s32 1, %v2463_v43 }
 0x129   :  { %650 = vmatprep.subr.mxu0 %v3396_v7  ;;  %721 = vmatprep.subr.mxu1 %v3397_v34  ;;  %v176_v12 = vpop.f32.mrf.mxu0  ;;  %v3404_v34 = vld [vmem:[#allocation31_spill] sm:$0xff] }
 0x12a   :  { %651 = vmatpush1.msra.mxu0 %v3398_v16  ;;  %684 = vmatprep.mubr.f32.mxu0 %v3399_v6  ;;  %v2568_v16 = vrot.slane %v3404_v34, %v3289_v8 }
 0x12b   :  { %722 = vmatpush1.msra.mxu1 %v3400_v9  ;;  %755 = vmatprep.mubr.f32.mxu1 %v3399_v6  ;;  %v2563_v10 = vpop.f32.mrf.mxu0 }
 0x12c   :  { %790 = vmatprep.subr.mxu0 %v3401_v25  ;;  %861 = vmatprep.subr.mxu1 %v3402_v61  ;;  %3403 = vst [vmem:[#allocation34_spill] sm:$0xff] %v2563_v10  ;;  %3405 = vst [vmem:[#allocation31_spill] sm:$0xff] %v2568_v16 }
 0x12d   :  { %v182_v7 = vpop.f32.mrf.mxu0 }
 0x12e   :  { %v2571_v9 = vadd.f32 %v182_v7, %v2568_v16 }
 0x12f   :  { %v2573_v6 = vpop.f32.mrf.mxu0 }
 0x130   :  { %3406 = vst [vmem:[#allocation35_spill] sm:$0xff] %v2571_v9  ;;  %3407 = vst [vmem:[#allocation36_spill] sm:$0xff] %v2573_v6 }
 0x131   :  { %v188_v25 = vpop.f32.mrf.mxu0 }
 0x132   :  { %v2576_v61 = vadd.f32 %v188_v25, %v2568_v16  ;;  %v287_v25 = vpop.f32.mrf.mxu1 }
 0x133   :  { %v2578_v1 = vpop.f32.mrf.mxu0 }
 0x134   :  { %3408 = vst [vmem:[#allocation37_spill] sm:$0xff] %v2576_v61  ;;  %3409 = vst [vmem:[#allocation38_spill] sm:$0xff] %v2578_v1  ;;  %v289_v61 = vpop.f32.mrf.mxu1 }
 0x135   :  { %v194_v3 = vpop.f32.mrf.mxu0 }
 0x136   :  { %v2581_v10 = vadd.f32 %v194_v3, %v2568_v16  ;;  %v2593_v4 = vpop.f32.mrf.mxu1 }
 0x137   :  { %v2583_v43 = vpop.f32.mrf.mxu0  ;;  %3415 = vst [vmem:[#allocation44_spill] sm:$0xff] %v2593_v4 }
 0x138   :  { %3410 = vst [vmem:[#allocation39_spill] sm:$0xff] %v2581_v10  ;;  %3411 = vst [vmem:[#allocation40_spill] sm:$0xff] %v2583_v43  ;;  %v2595_v1 = vpop.f32.mrf.mxu1 }
 0x139   :  { %v200_v34 = vpop.f32.mrf.mxu0  ;;  %3416 = vst [vmem:[#allocation45_spill] sm:$0xff] %v2595_v1  ;;  %v3427_v1 = vld [vmem:[#allocation32_spill] sm:$0xff] }
 0x13a   :  { %v2586_v8 = vadd.f32 %v200_v34, %v2568_v16  ;;  %v2597_v3 = vpop.f32.mrf.mxu1 }
 0x13b   :  { %v2588_v7 = vpop.f32.mrf.mxu0  ;;  %3417 = vst [vmem:[#allocation46_spill] sm:$0xff] %v2597_v3  ;;  %v175_v3 = vadd.f32 %v174_v11, %v3427_v1  ;;  %v290_v11 = vadd.f32 %v289_v61, %v2488_v5 }
 0x13c   :  { %3412 = vst [vmem:[#allocation41_spill] sm:$0xff] %v2586_v8  ;;  %3413 = vst [vmem:[#allocation42_spill] sm:$0xff] %v2588_v7  ;;  %v2599_v10 = vpop.f32.mrf.mxu1 }
 0x13d   :  { %v206_v9 = vpop.f32.mrf.mxu0  ;;  %3418 = vst [vmem:[#allocation47_spill] sm:$0xff] %v2599_v10  ;;  %v177_v10 = vadd.f32 %v176_v12, %v2568_v16 }
 0x13e   :  { %v2591_v6 = vadd.f32 %v206_v9, %v2568_v16  ;;  %v2601_v43 = vpop.f32.mrf.mxu1 }
 0x13f   :  { %3419 = vst [vmem:[#allocation48_spill] sm:$0xff] %v2601_v43 }
 0x140   :  { %3414 = vst [vmem:[#allocation43_spill] sm:$0xff] %v2591_v6  ;;  %v2603_v34 = vpop.f32.mrf.mxu1  ;;  %v2611_v6 = vpop.f32.mrf.mxu0 }
 0x141   :  { %3420 = vst [vmem:[#allocation49_spill] sm:$0xff] %v2603_v34  ;;  %3424 = vst [vmem:[#allocation53_spill] sm:$0xff] %v2611_v6 }
 0x142   :  { %v2605_v8 = vpop.f32.mrf.mxu1  ;;  %v2615_v4 = vpop.f32.mrf.mxu0 }
 0x143   :  { %3421 = vst [vmem:[#allocation50_spill] sm:$0xff] %v2605_v8  ;;  %3426 = vst [vmem:[#allocation55_spill] sm:$0xff] %v2615_v4 }
 0x144   :  { %v2607_v7 = vpop.f32.mrf.mxu1 }
 0x145   :  { %3422 = vst [vmem:[#allocation51_spill] sm:$0xff] %v2607_v7 }
 0x146   :  { %v2609_v9 = vpop.f32.mrf.mxu1 }
 0x147   :  { %3423 = vst [vmem:[#allocation52_spill] sm:$0xff] %v2609_v9 }
 0x148   :  { %v2613_v0 = vpop.f32.mrf.mxu1 }
 0x149   :  { %3425 = vst [vmem:[#allocation54_spill] sm:$0xff] %v2613_v0  ;;  %v3430_v0 = vld [vmem:[#allocation33_spill] sm:$0xff] }
 0x14a   :  { %v2619_v43 = vpop.f32.mrf.mxu1  ;;  %v288_v59 = vadd.f32 %v287_v25, %v3430_v0 }
 0x14b   :  { %3428 = vst [vmem:[#allocation56_spill] sm:$0xff] %v2619_v43 }
 0x14c   :  { %v2621_v7 = vpop.f32.mrf.mxu1 }
 0x14d   :  { %3429 = vst [vmem:[#allocation57_spill] sm:$0xff] %v2621_v7  ;;  %v3450_v7 = vld [vmem:[#allocation27_spill] sm:$0xff] }
 0x1cb   :  { %v516_v2 = vpop.f32.mrf.mxu0  ;;  %v587_v6 = vpop.f32.mrf.mxu1 }
 0x1cc   :  { %v517_v34 = vadd.f32 %v516_v2, %v175_v3  ;;  %v588_v4 = vadd.f32 %v587_v6, %v288_v59  ;;  %v381_v59 = vsel %vm379_vm1, %v2491_v52, 0.0  ;;  %v3431_v52 = vld [vmem:[#allocation10_spill] sm:$0xff] }
 0x1cd   :  { %v518_v63 = vpop.f32.mrf.mxu0  ;;  %v589_v60 = vpop.f32.mrf.mxu1 }
 0x1ce   :  { %v1880_v8 = vmul.f32 -1.442695, %v517_v34  ;;  %v519_v62 = vadd.f32 %v518_v63, %v177_v10  ;;  %v1882_v1 = vmul.f32 -1.442695, %v588_v4  ;;  %v590_v16 = vadd.f32 %v589_v60, %v290_v11  ;;  %v3433_v34 = vld [vmem:[#allocation11_spill] sm:$0xff]  ;;  %v3435_v11 = vld [vmem:[#allocation14_spill] sm:$0xff] }
 0x1d0   :  { %1926 = vpow2.f32 %v1880_v8  ;;  %v1881_v9 = vmul.f32 -1.442695, %v519_v62 }
 0x1d2   :  { %1928 = vpow2.f32 %v1881_v9  ;;  %v3434_v9 = vld [vmem:[#allocation12_spill] sm:$0xff] }
 0x1d3   :  { %1930 = vpow2.f32 %v1882_v1 }
 0x1dd   :  { %v1927_v12 = vpop.eup %1926 }
 0x1de   :  { %v601_v43 = vadd.f32 1.0, %v1927_v12  ;;  %v3436_v12 = vld [vmem:[#allocation13_spill] sm:$0xff] }
 0x1df   :  { %v1929_v2 = vpop.eup %1928 }
 0x1e0   :  { %1932 = vrcp.f32 %v601_v43  ;;  %v602_v63 = vadd.f32 1.0, %v1929_v2  ;;  %v1931_v10 = vpop.eup %1930  ;;  %v3437_v2 = vld [vmem:[#allocation16_spill] sm:$0xff] }
 0x1e1   :  { %1934 = vtanh.f32 %v590_v16  ;;  %v603_v6 = vadd.f32 1.0, %v1931_v10  ;;  %v3432_v16 = vld [vmem:[#allocation9_spill] sm:$0xff]  ;;  %v3439_v10 = vld [vmem:[#allocation18_spill] sm:$0xff] }
 0x1e2   :  { %1936 = vrcp.f32 %v602_v63  ;;  %v3438_v63 = vld [vmem:[#allocation15_spill] sm:$0xff] }
 0x1e3   :  { %1938 = vrcp.f32 %v603_v6  ;;  %v3444_v6 = vld [vmem:[#allocation21_spill] sm:$0xff] }
 0x1ed   :  { %v1933_v62 = vpop.eup %1932 }
 0x1ee   :  { %v1935_v8 = vpop.eup %1934 }
 0x1ef   :  { %v1937_v3 = vpop.eup %1936  ;;  %v612_v61 = vmul.f32 %v1935_v8, %v1933_v62  ;;  %v3440_v62 = vld [vmem:[#allocation17_spill] sm:$0xff]  ;;  %v3441_v8 = vld [vmem:[#allocation19_spill] sm:$0xff] }
 0x1f0   :  { %v611_v25 = vmul.f32 %v1937_v3, %v381_v59  ;;  %v1939_v60 = vpop.eup %1938  ;;  %v3442_v3 = vld [vmem:[#allocation20_spill] sm:$0xff]  ;;  %v3443_v59 = vld [vmem:[#allocation22_spill] sm:$0xff] }
 0x1f2   :  { %v2627_v4 = vadd.f32 %v612_v61, %v611_v25  ;;  %v3445_v25 = vld [vmem:[#allocation24_spill] sm:$0xff]  ;;  %v3446_v61 = vld [vmem:[#allocation23_spill] sm:$0xff] }
 0x1f4   :  { %1940 = vtanh.f32 %v2627_v4 }
 0x201   :  { %v1941_v43 = vpop.eup %1940 }
 0x202   :  { %v615_v1 = vmul.f32 %v1941_v43, %v1939_v60  ;;  %v3447_v60 = vld [vmem:[#allocation26_spill] sm:$0xff]  ;;  %v3448_v43 = vld [vmem:[#allocation25_spill] sm:$0xff] }
 0x204   :  { %685 = vmatmul.mubr.f32.vlgmr.msra.gmra.mxu0 %v615_v1  ;;  %756 = vmatmul.mubr.f32.vlgmr.msra.gmra.mxu1 %v615_v1  ;;  %v3449_v1 = vld [vmem:[#allocation28_spill] sm:$0xff] }
 0x205   :  { %791 = vmatpush1.msra.mxu0 %v2225_v13  ;;  %862 = vmatpush1.msra.mxu1 %v2228_v14 }
 0x206   :  { %792 = vmatprep.subr.mxu0 %v2231_v15  ;;  %863 = vmatprep.subr.mxu1 %v2241_v18 }
 0x207   :  { %793 = vmatpush1.msra.mxu0 %v2237_v17  ;;  %864 = vmatpush1.msra.mxu1 %v2245_v20 }
 0x208   :  { %794 = vmatprep.subr.mxu0 %v2243_v19  ;;  %865 = vmatprep.subr.mxu1 %v2251_v22 }
 0x209   :  { %795 = vmatpush1.msra.mxu0 %v2249_v21  ;;  %866 = vmatpush1.msra.mxu1 %v2257_v24 }
 0x20a   :  { %796 = vmatprep.subr.mxu0 %v2255_v23  ;;  %867 = vmatprep.subr.mxu1 %v2264_v26 }
 0x20b   :  { %797 = vmatpush1.msra.mxu0 %v2268_v27  ;;  %868 = vmatpush1.msra.mxu1 %v2274_v29 }
 0x20c   :  { %798 = vmatprep.subr.mxu0 %v2272_v28  ;;  %869 = vmatprep.subr.mxu1 %v2282_v31 }
 0x20d   :  { %799 = vmatpush1.msra.mxu0 %v2278_v30  ;;  %870 = vmatpush1.msra.mxu1 %v2288_v33 }
 0x20e   :  { %800 = vmatprep.subr.mxu0 %v2286_v32  ;;  %871 = vmatprep.subr.mxu1 %v2295_v35 }
 0x20f   :  { %801 = vmatpush1.msra.mxu0 %v2299_v36  ;;  %872 = vmatpush1.msra.mxu1 %v2305_v38 }
 0x210   :  { %802 = vmatprep.subr.mxu0 %v2303_v37  ;;  %873 = vmatprep.subr.mxu1 %v2313_v40 }
 0x211   :  { %803 = vmatpush1.msra.mxu0 %v2309_v39  ;;  %874 = vmatpush1.msra.mxu1 %v2319_v42 }
 0x212   :  { %804 = vmatprep.subr.mxu0 %v2317_v41  ;;  %875 = vmatprep.subr.mxu1 %v2326_v44 }
 0x213   :  { %805 = vmatpush1.msra.mxu0 %v2330_v45  ;;  %876 = vmatpush1.msra.mxu1 %v2336_v47 }
 0x214   :  { %806 = vmatprep.subr.mxu0 %v2334_v46  ;;  %877 = vmatprep.subr.mxu1 %v2344_v49 }
 0x215   :  { %807 = vmatpush1.msra.mxu0 %v2340_v48  ;;  %878 = vmatpush1.msra.mxu1 %v2350_v51 }
 0x216   :  { %808 = vmatprep.subr.mxu0 %v2348_v50  ;;  %879 = vmatprep.subr.mxu1 %v2357_v53 }
 0x217   :  { %809 = vmatpush1.msra.mxu0 %v2361_v54  ;;  %880 = vmatpush1.msra.mxu1 %v2367_v56 }
 0x218   :  { %810 = vmatprep.subr.mxu0 %v2365_v55  ;;  %881 = vmatprep.subr.mxu1 %v2375_v58 }
 0x219   :  { %811 = vmatpush1.msra.mxu0 %v2371_v57  ;;  %882 = vmatpush1.msra.mxu1 %v3431_v52 }
 0x21a   :  { %812 = vmatprep.subr.mxu0 %v3432_v16  ;;  %883 = vmatprep.subr.mxu1 %v3433_v34 }
 0x21b   :  { %813 = vmatpush1.msra.mxu0 %v3434_v9  ;;  %884 = vmatpush1.msra.mxu1 %v3435_v11 }
 0x21c   :  { %814 = vmatprep.subr.mxu0 %v3436_v12  ;;  %885 = vmatprep.subr.mxu1 %v3437_v2 }
 0x21d   :  { %815 = vmatpush1.msra.mxu0 %v3438_v63  ;;  %886 = vmatpush1.msra.mxu1 %v3439_v10 }
 0x21e   :  { %816 = vmatprep.subr.mxu0 %v3440_v62  ;;  %887 = vmatprep.subr.mxu1 %v3441_v8  ;;  %v3451_v62 = vmov 0.0   ;;  %v3452_v8 = vld [vmem:[#allocation29_spill] sm:$0xff] }
 0x21f   :  { %817 = vmatpush1.msra.mxu0 %v3442_v3  ;;  %888 = vmatpush1.msra.mxu1 %v3443_v59  ;;  %v3453_v59 = vld [vmem:[#allocation7_spill] sm:$0xff] }
 0x220   :  { %818 = vmatprep.subr.mxu0 %v3444_v6  ;;  %889 = vmatprep.subr.mxu1 %v3445_v25  ;;  %v3454_v6 = vld [vmem:[#allocation8_spill] sm:$0xff] }
 0x221   :  { %819 = vmatpush1.msra.mxu0 %v3446_v61  ;;  %890 = vmatpush1.msra.mxu1 %v3447_v60  ;;  %v3455_v25 = vld [vmem:[#allocation32_spill] sm:$0xff]  ;;  %v3456_v61 = vld [vmem:[#allocation34_spill] sm:$0xff] }
 0x222   :  { %820 = vmatprep.subr.mxu0 %v3448_v43  ;;  %891 = vmatprep.subr.mxu1 %v3449_v1  ;;  %v181_v3 = vadd.f32 %v3456_v61, %v3455_v25  ;;  %v3457_v1 = vld [vmem:[#allocation35_spill] sm:$0xff] }
 0x223   :  { %821 = vmatpush1.msra.mxu0 %v3450_v7  ;;  %854 = vmatprep.mubr.f32.mxu0 %v3451_v62 }
 0x224   :  { %892 = vmatpush1.msra.mxu1 %v3452_v8  ;;  %925 = vmatprep.mubr.f32.mxu1 %v3451_v62  ;;  %v3458_v8 = vld [vmem:[#allocation44_spill] sm:$0xff] }
 0x225   :  { %960 = vmatprep.subr.mxu0 %v3453_v59  ;;  %1031 = vmatprep.subr.mxu1 %v3454_v6  ;;  %v294_v62 = vadd.f32 %v3458_v8, %v3430_v0  ;;  %v3459_v6 = vld [vmem:[#allocation45_spill] sm:$0xff] }
 0x226   :  { %v296_v9 = vadd.f32 %v3459_v6, %v2488_v5 }
 0x2c4   :  { %v686_v60 = vpop.f32.mrf.mxu0  ;;  %v757_v12 = vpop.f32.mrf.mxu1 }
 0x2c5   :  { %v687_v10 = vadd.f32 %v686_v60, %v181_v3  ;;  %v758_v11 = vadd.f32 %v757_v12, %v294_v62 }
 0x2c6   :  { %v688_v43 = vpop.f32.mrf.mxu0  ;;  %v759_v59 = vpop.f32.mrf.mxu1 }
 0x2c7   :  { %v1883_v63 = vmul.f32 -1.442695, %v687_v10  ;;  %v689_v2 = vadd.f32 %v688_v43, %v3457_v1  ;;  %v1885_v34 = vmul.f32 -1.442695, %v758_v11  ;;  %v760_v61 = vadd.f32 %v759_v59, %v296_v9 }
 0x2c9   :  { %1942 = vpow2.f32 %v1883_v63  ;;  %v1884_v7 = vmul.f32 -1.442695, %v689_v2 }
 0x2cb   :  { %1944 = vpow2.f32 %v1884_v7 }
 0x2cc   :  { %1946 = vpow2.f32 %v1885_v34 }
 0x2cd   :  { %1948 = vtanh.f32 %v760_v61 }
 0x2d6   :  { %v1943_v25 = vpop.eup %1942 }
 0x2d7   :  { %v771_v3 = vadd.f32 1.0, %v1943_v25  ;;  %v3484_v25 = vld [vmem:[#allocation37_spill] sm:$0xff] }
 0x2d8   :  { %v1945_v10 = vpop.eup %1944 }
 0x2d9   :  { %1950 = vrcp.f32 %v771_v3  ;;  %v772_v63 = vadd.f32 1.0, %v1945_v10  ;;  %v1947_v7 = vpop.eup %1946  ;;  %v3485_v3 = vld [vmem:[#allocation46_spill] sm:$0xff] }
 0x2da   :  { %v1949_v2 = vpop.eup %1948  ;;  %v773_v12 = vadd.f32 1.0, %v1947_v7  ;;  %v300_v10 = vadd.f32 %v3485_v3, %v3430_v0  ;;  %v2788_v3 = vld [vmem:[#allocation4 + $0x1e0] sm:$0xff] }
 0x2db   :  { %1952 = vrcp.f32 %v772_v63 }
 0x2dc   :  { %1954 = vrcp.f32 %v773_v12 }
 0x2e6   :  { %v1951_v60 = vpop.eup %1950 }
 0x2e7   :  { %v782_v43 = vmul.f32 %v1951_v60, %v1949_v2  ;;  %v3486_v2 = vld [vmem:[#allocation47_spill] sm:$0xff] }
 0x2e8   :  { %v1953_v8 = vpop.eup %1952  ;;  %v302_v60 = vadd.f32 %v3486_v2, %v2488_v5  ;;  %v2803_v2 = vld [vmem:[#allocation4 + $0x1d0] sm:$0xff] }
 0x2e9   :  { %v781_v62 = vmul.f32 %v1953_v8, %v2627_v4  ;;  %v1955_v9 = vpop.eup %1954 }
 0x2eb   :  { %v2704_v1 = vadd.f32 %v782_v43, %v781_v62 }
 0x2ed   :  { %1956 = vtanh.f32 %v2704_v1 }
 0x2fa   :  { %v1957_v34 = vpop.eup %1956 }
 0x2fb   :  { %v785_v11 = vmul.f32 %v1957_v34, %v1955_v9 }
 0x2fd   :  { %855 = vmatmul.mubr.f32.vlgmr.msra.gmra.mxu0 %v785_v11  ;;  %926 = vmatmul.mubr.f32.vlgmr.msra.gmra.mxu1 %v785_v11 }
 0x2fe   :  { %961 = vmatpush1.msra.mxu0 %v2225_v13  ;;  %1032 = vmatpush1.msra.mxu1 %v2228_v14  ;;  %v3460_v13 = vld [vmem:[#allocation11_spill] sm:$0xff]  ;;  %v3461_v14 = vld [vmem:[#allocation12_spill] sm:$0xff] }
 0x2ff   :  { %962 = vmatprep.subr.mxu0 %v2231_v15  ;;  %1033 = vmatprep.subr.mxu1 %v2241_v18  ;;  %v3462_v15 = vld [vmem:[#allocation14_spill] sm:$0xff]  ;;  %v3464_v18 = vld [vmem:[#allocation16_spill] sm:$0xff] }
 0x300   :  { %963 = vmatpush1.msra.mxu0 %v2237_v17  ;;  %1034 = vmatpush1.msra.mxu1 %v2245_v20  ;;  %v3463_v17 = vld [vmem:[#allocation13_spill] sm:$0xff]  ;;  %v3466_v20 = vld [vmem:[#allocation18_spill] sm:$0xff] }
 0x301   :  { %964 = vmatprep.subr.mxu0 %v2243_v19  ;;  %1035 = vmatprep.subr.mxu1 %v2251_v22  ;;  %v3465_v19 = vld [vmem:[#allocation15_spill] sm:$0xff] }
 0x302   :  { %965 = vmatpush1.msra.mxu0 %v2249_v21  ;;  %1036 = vmatpush1.msra.mxu1 %v2257_v24  ;;  %v3467_v21 = vld [vmem:[#allocation17_spill] sm:$0xff]  ;;  %v3468_v22 = vld [vmem:[#allocation19_spill] sm:$0xff]  ;;  %v3470_v24 = vld [vmem:[#allocation22_spill] sm:$0xff] }
 0x303   :  { %966 = vmatprep.subr.mxu0 %v2255_v23  ;;  %1037 = vmatprep.subr.mxu1 %v2264_v26  ;;  %v3469_v23 = vld [vmem:[#allocation20_spill] sm:$0xff]  ;;  %v3471_v26 = vld [vmem:[#allocation21_spill] sm:$0xff] }
 0x304   :  { %967 = vmatpush1.msra.mxu0 %v2268_v27  ;;  %1038 = vmatpush1.msra.mxu1 %v2274_v29  ;;  %v3472_v27 = vld [vmem:[#allocation24_spill] sm:$0xff]  ;;  %v3474_v29 = vld [vmem:[#allocation26_spill] sm:$0xff] }
 0x305   :  { %968 = vmatprep.subr.mxu0 %v2272_v28  ;;  %1039 = vmatprep.subr.mxu1 %v2282_v31  ;;  %v3473_v28 = vld [vmem:[#allocation23_spill] sm:$0xff]  ;;  %v3476_v31 = vld [vmem:[#allocation28_spill] sm:$0xff] }
 0x306   :  { %969 = vmatpush1.msra.mxu0 %v2278_v30  ;;  %1040 = vmatpush1.msra.mxu1 %v2288_v33  ;;  %v3475_v30 = vld [vmem:[#allocation25_spill] sm:$0xff]  ;;  %v3478_v33 = vmov 0.0  }
 0x307   :  { %970 = vmatprep.subr.mxu0 %v2286_v32  ;;  %1041 = vmatprep.subr.mxu1 %v2295_v35  ;;  %v3477_v32 = vld [vmem:[#allocation27_spill] sm:$0xff]  ;;  %v3479_v35 = vld [vmem:[#allocation29_spill] sm:$0xff] }
 0x308   :  { %971 = vmatpush1.msra.mxu0 %v2299_v36  ;;  %1042 = vmatpush1.msra.mxu1 %v2305_v38  ;;  %v2771_v36 = vld [vmem:[#allocation4 + $0x1e8] sm:$0xff] }
 0x309   :  { %972 = vmatprep.subr.mxu0 %v2303_v37  ;;  %1043 = vmatprep.subr.mxu1 %v2313_v40  ;;  %3480 = vst [vmem:[#allocation33_spill] sm:$0xff] %v2771_v36  ;;  %v2774_v37 = vld [vmem:[#allocation4 + $0x1f8] sm:$0xff]  ;;  %v3482_v38 = vld [vmem:[#allocation32_spill] sm:$0xff] }
 0x30a   :  { %973 = vmatpush1.msra.mxu0 %v2309_v39  ;;  %1044 = vmatpush1.msra.mxu1 %v2319_v42  ;;  %3481 = vst [vmem:[#allocation10_spill] sm:$0xff] %v2774_v37  ;;  %v3483_v39 = vld [vmem:[#allocation36_spill] sm:$0xff] }
 0x30b   :  { %974 = vmatprep.subr.mxu0 %v2317_v41  ;;  %1045 = vmatprep.subr.mxu1 %v2326_v44  ;;  %v187_v40 = vadd.f32 %v3483_v39, %v3482_v38 }
 0x30c   :  { %975 = vmatpush1.msra.mxu0 %v2330_v45  ;;  %1046 = vmatpush1.msra.mxu1 %v2336_v47 }
 0x30d   :  { %976 = vmatprep.subr.mxu0 %v2334_v46  ;;  %1047 = vmatprep.subr.mxu1 %v2344_v49 }
 0x30e   :  { %977 = vmatpush1.msra.mxu0 %v2340_v48  ;;  %1048 = vmatpush1.msra.mxu1 %v2350_v51 }
 0x30f   :  { %978 = vmatprep.subr.mxu0 %v2348_v50  ;;  %1049 = vmatprep.subr.mxu1 %v2357_v53 }
 0x310   :  { %979 = vmatpush1.msra.mxu0 %v2361_v54  ;;  %1050 = vmatpush1.msra.mxu1 %v2367_v56 }
 0x311   :  { %980 = vmatprep.subr.mxu0 %v2365_v55  ;;  %1051 = vmatprep.subr.mxu1 %v2375_v58 }
 0x312   :  { %981 = vmatpush1.msra.mxu0 %v2371_v57  ;;  %1052 = vmatpush1.msra.mxu1 %v3431_v52 }
 0x313   :  { %982 = vmatprep.subr.mxu0 %v3432_v16  ;;  %1053 = vmatprep.subr.mxu1 %v3460_v13 }
 0x314   :  { %983 = vmatpush1.msra.mxu0 %v3461_v14  ;;  %1054 = vmatpush1.msra.mxu1 %v3462_v15 }
 0x315   :  { %984 = vmatprep.subr.mxu0 %v3463_v17  ;;  %1055 = vmatprep.subr.mxu1 %v3464_v18 }
 0x316   :  { %985 = vmatpush1.msra.mxu0 %v3465_v19  ;;  %1056 = vmatpush1.msra.mxu1 %v3466_v20 }
 0x317   :  { %986 = vmatprep.subr.mxu0 %v3467_v21  ;;  %1057 = vmatprep.subr.mxu1 %v3468_v22 }
 0x318   :  { %987 = vmatpush1.msra.mxu0 %v3469_v23  ;;  %1058 = vmatpush1.msra.mxu1 %v3470_v24 }
 0x319   :  { %988 = vmatprep.subr.mxu0 %v3471_v26  ;;  %1059 = vmatprep.subr.mxu1 %v3472_v27 }
 0x31a   :  { %989 = vmatpush1.msra.mxu0 %v3473_v28  ;;  %1060 = vmatpush1.msra.mxu1 %v3474_v29 }
 0x31b   :  { %990 = vmatprep.subr.mxu0 %v3475_v30  ;;  %1061 = vmatprep.subr.mxu1 %v3476_v31 }
 0x31c   :  { %991 = vmatpush1.msra.mxu0 %v3477_v32  ;;  %1024 = vmatprep.mubr.f32.mxu0 %v3478_v33 }
 0x31d   :  { %1062 = vmatpush1.msra.mxu1 %v3479_v35  ;;  %1095 = vmatprep.mubr.f32.mxu1 %v3478_v33 }
 0x31e   :  { %1130 = vmatprep.subr.mxu0 %v2771_v36  ;;  %1201 = vmatprep.subr.mxu1 %v2774_v37 }
 0x3bd   :  { %v856_v41 = vpop.f32.mrf.mxu0  ;;  %v927_v61 = vpop.f32.mrf.mxu1 }
 0x3be   :  { %v857_v42 = vadd.f32 %v856_v41, %v187_v40  ;;  %v928_v63 = vadd.f32 %v927_v61, %v300_v10  ;;  %v2791_v10 = vld [vmem:[#allocation4 + $0x1f0] sm:$0xff] }
 0x3bf   :  { %v858_v44 = vpop.f32.mrf.mxu0  ;;  %v929_v7 = vpop.f32.mrf.mxu1 }
 0x3c0   :  { %v1886_v4 = vmul.f32 -1.442695, %v857_v42  ;;  %v859_v59 = vadd.f32 %v858_v44, %v3484_v25  ;;  %v1888_v43 = vmul.f32 -1.442695, %v928_v63  ;;  %v930_v8 = vadd.f32 %v929_v7, %v302_v60  ;;  %v2794_v63 = vld [vmem:[#allocation4 + $0x1c8] sm:$0xff]  ;;  %v2800_v7 = vld [vmem:[#allocation4 + $0x1c0] sm:$0xff] }
 0x3c1   :  { %v2806_v60 = vld [vmem:[#allocation4 + $0x1a8] sm:$0xff] }
 0x3c2   :  { %1958 = vpow2.f32 %v1886_v4  ;;  %v1887_v6 = vmul.f32 -1.442695, %v859_v59 }
 0x3c4   :  { %1960 = vpow2.f32 %v1887_v6 }
 0x3c5   :  { %1962 = vpow2.f32 %v1888_v43  ;;  %v2809_v43 = vld [vmem:[#allocation4 + $0x1b8] sm:$0xff] }
 0x3c6   :  { %1964 = vtanh.f32 %v930_v8  ;;  %v2812_v8 = vld [vmem:[#allocation4 + $0x1a0] sm:$0xff] }
 0x3cf   :  { %v1959_v12 = vpop.eup %1958 }
 0x3d0   :  { %v941_v62 = vadd.f32 1.0, %v1959_v12  ;;  %v2815_v12 = vld [vmem:[#allocation4 + $0x1b0] sm:$0xff] }
 0x3d1   :  { %v1961_v9 = vpop.eup %1960 }
 0x3d2   :  { %1966 = vrcp.f32 %v941_v62  ;;  %v942_v34 = vadd.f32 1.0, %v1961_v9  ;;  %v1963_v11 = vpop.eup %1962  ;;  %v2818_v62 = vld [vmem:[#allocation4 + $0x188] sm:$0xff]  ;;  %v2821_v9 = vld [vmem:[#allocation4 + $0x198] sm:$0xff] }
 0x3d3   :  { %v1965_v39 = vpop.eup %1964  ;;  %v943_v44 = vadd.f32 1.0, %v1963_v11  ;;  %v2827_v11 = vld [vmem:[#allocation4 + $0x190] sm:$0xff] }
 0x3d4   :  { %1968 = vrcp.f32 %v942_v34  ;;  %v2824_v34 = vld [vmem:[#allocation4 + $0x180] sm:$0xff] }
 0x3d5   :  { %1970 = vrcp.f32 %v943_v44  ;;  %v2842_v44 = vld [vmem:[#allocation4 + $0x148] sm:$0xff] }
 0x3d6   :  { %3488 = vst [vmem:[#allocation7_spill] sm:$0xff] %v2842_v44 }
 0x3df   :  { %v1967_v40 = vpop.eup %1966 }
 0x3e0   :  { %v952_v41 = vmul.f32 %v1967_v40, %v1965_v39  ;;  %v2830_v39 = vld [vmem:[#allocation4 + $0x168] sm:$0xff]  ;;  %v2833_v40 = vld [vmem:[#allocation4 + $0x178] sm:$0xff] }
 0x3e1   :  { %v1969_v42 = vpop.eup %1968 }
 0x3e2   :  { %v951_v4 = vmul.f32 %v1969_v42, %v2704_v1  ;;  %v1971_v59 = vpop.eup %1970  ;;  %v2797_v1 = vld [vmem:[#allocation4 + $0x1d8] sm:$0xff]  ;;  %v2839_v42 = vld [vmem:[#allocation4 + $0x170] sm:$0xff] }
 0x3e3   :  { %3487 = vst [vmem:[#allocation9_spill] sm:$0xff] %v2839_v42 }
 0x3e4   :  { %v2785_v25 = vadd.f32 %v952_v41, %v951_v4  ;;  %v2836_v41 = vld [vmem:[#allocation4 + $0x160] sm:$0xff]  ;;  %v2845_v4 = vld [vmem:[#allocation4 + $0x158] sm:$0xff] }
 0x3e5   :  { %3489 = vst [vmem:[#allocation8_spill] sm:$0xff] %v2845_v4 }
 0x3e6   :  { %1972 = vtanh.f32 %v2785_v25 }
 0x3f3   :  { %v1973_v6 = vpop.eup %1972 }
 0x3f4   :  { %v955_v61 = vmul.f32 %v1973_v6, %v1971_v59  ;;  %v2848_v59 = vld [vmem:[#allocation4 + $0x140] sm:$0xff]  ;;  %v2851_v6 = vld [vmem:[#allocation4 + $0x150] sm:$0xff] }
 0x3f5   :  { %3490 = vst [vmem:[#allocation34_spill] sm:$0xff] %v2848_v59  ;;  %3491 = vst [vmem:[#allocation35_spill] sm:$0xff] %v2851_v6 }
 0x3f6   :  { %1025 = vmatmul.mubr.f32.vlgmr.msra.gmra.mxu0 %v955_v61  ;;  %1096 = vmatmul.mubr.f32.vlgmr.msra.gmra.mxu1 %v955_v61  ;;  %v2854_v61 = vld [vmem:[#allocation4 + $0x128] sm:$0xff] }
 0x3f7   :  { %1131 = vmatpush1.msra.mxu0 %v2788_v3  ;;  %1202 = vmatpush1.msra.mxu1 %v2791_v10 }
 0x3f8   :  { %1132 = vmatprep.subr.mxu0 %v2794_v63  ;;  %1203 = vmatprep.subr.mxu1 %v2797_v1 }
 0x3f9   :  { %1133 = vmatpush1.msra.mxu0 %v2800_v7  ;;  %1204 = vmatpush1.msra.mxu1 %v2803_v2 }
 0x3fa   :  { %1134 = vmatprep.subr.mxu0 %v2806_v60  ;;  %1205 = vmatprep.subr.mxu1 %v2809_v43 }
 0x3fb   :  { %1135 = vmatpush1.msra.mxu0 %v2812_v8  ;;  %1206 = vmatpush1.msra.mxu1 %v2815_v12 }
 0x3fc   :  { %1136 = vmatprep.subr.mxu0 %v2818_v62  ;;  %1207 = vmatprep.subr.mxu1 %v2821_v9 }
 0x3fd   :  { %1137 = vmatpush1.msra.mxu0 %v2824_v34  ;;  %1208 = vmatpush1.msra.mxu1 %v2827_v11 }
 0x3fe   :  { %1138 = vmatprep.subr.mxu0 %v2830_v39  ;;  %1209 = vmatprep.subr.mxu1 %v2833_v40 }
 0x3ff   :  { %1139 = vmatpush1.msra.mxu0 %v2836_v41  ;;  %1210 = vmatpush1.msra.mxu1 %v2839_v42  ;;  %v2857_v42 = vld [vmem:[#allocation4 + $0x138] sm:$0xff] }
 0x400   :  { %1140 = vmatprep.subr.mxu0 %v2842_v44  ;;  %1211 = vmatprep.subr.mxu1 %v2845_v4  ;;  %v2860_v44 = vld [vmem:[#allocation4 + $0x120] sm:$0xff]  ;;  %v2863_v4 = vld [vmem:[#allocation4 + $0x130] sm:$0xff] }
 0x401   :  { %1141 = vmatpush1.msra.mxu0 %v2848_v59  ;;  %1212 = vmatpush1.msra.mxu1 %v2851_v6  ;;  %v2866_v59 = vld [vmem:[#allocation4 + $0x108] sm:$0xff]  ;;  %v2869_v6 = vld [vmem:[#allocation4 + $0x118] sm:$0xff] }
 0x402   :  { %1142 = vmatprep.subr.mxu0 %v2854_v61  ;;  %1213 = vmatprep.subr.mxu1 %v2857_v42 }
 0x403   :  { %1143 = vmatpush1.msra.mxu0 %v2860_v44  ;;  %1214 = vmatpush1.msra.mxu1 %v2863_v4 }
 0x404   :  { %1144 = vmatprep.subr.mxu0 %v2866_v59  ;;  %1215 = vmatprep.subr.mxu1 %v2869_v6 }
 0x405   :  { %1145 = vmatpush1.msra.mxu0 %v2330_v45  ;;  %1216 = vmatpush1.msra.mxu1 %v2336_v47  ;;  %v3492_v45 = vld [vmem:[#allocation38_spill] sm:$0xff] }
 0x406   :  { %1146 = vmatprep.subr.mxu0 %v2334_v46  ;;  %1217 = vmatprep.subr.mxu1 %v2344_v49  ;;  %v193_v46 = vadd.f32 %v3492_v45, %v3482_v38  ;;  %v3498_v45 = vld [vmem:[#allocation8_spill] sm:$0xff] }
 0x407   :  { %1147 = vmatpush1.msra.mxu0 %v2340_v48  ;;  %1218 = vmatpush1.msra.mxu1 %v2350_v51  ;;  %v3493_v51 = vld [vmem:[#allocation39_spill] sm:$0xff] }
 0x408   :  { %1148 = vmatprep.subr.mxu0 %v2348_v50  ;;  %1219 = vmatprep.subr.mxu1 %v2357_v53 }
 0x409   :  { %1149 = vmatpush1.msra.mxu0 %v2361_v54  ;;  %1220 = vmatpush1.msra.mxu1 %v2367_v56  ;;  %v3494_v56 = vld [vmem:[#allocation48_spill] sm:$0xff] }
 0x40a   :  { %1150 = vmatprep.subr.mxu0 %v2365_v55  ;;  %1221 = vmatprep.subr.mxu1 %v2375_v58 }
 0x40b   :  { %1151 = vmatpush1.msra.mxu0 %v2371_v57  ;;  %1222 = vmatpush1.msra.mxu1 %v3431_v52  ;;  %v306_v57 = vadd.f32 %v3494_v56, %v3430_v0  ;;  %v2970_v56 = vld [vmem:[#allocation4 + $0xd8] sm:$0xff] }
 0x40c   :  { %1152 = vmatprep.subr.mxu0 %v3432_v16  ;;  %1223 = vmatprep.subr.mxu1 %v3460_v13  ;;  %v3495_v16 = vld [vmem:[#allocation49_spill] sm:$0xff] }
 0x40d   :  { %1153 = vmatpush1.msra.mxu0 %v3461_v14  ;;  %1224 = vmatpush1.msra.mxu1 %v3462_v15  ;;  %v308_v13 = vadd.f32 %v3495_v16, %v2488_v5  ;;  %v2982_v16 = vld [vmem:[#allocation4 + $0xb8] sm:$0xff] }
 0x40e   :  { %1154 = vmatprep.subr.mxu0 %v3463_v17  ;;  %1225 = vmatprep.subr.mxu1 %v3464_v18 }
 0x40f   :  { %1155 = vmatpush1.msra.mxu0 %v3465_v19  ;;  %1226 = vmatpush1.msra.mxu1 %v3466_v20 }
 0x410   :  { %1156 = vmatprep.subr.mxu0 %v3467_v21  ;;  %1227 = vmatprep.subr.mxu1 %v3468_v22 }
 0x411   :  { %1157 = vmatpush1.msra.mxu0 %v3469_v23  ;;  %1228 = vmatpush1.msra.mxu1 %v3470_v24 }
 0x412   :  { %1158 = vmatprep.subr.mxu0 %v3471_v26  ;;  %1229 = vmatprep.subr.mxu1 %v3472_v27 }
 0x413   :  { %1159 = vmatpush1.msra.mxu0 %v3473_v28  ;;  %1230 = vmatpush1.msra.mxu1 %v3474_v29 }
 0x414   :  { %1160 = vmatprep.subr.mxu0 %v3475_v30  ;;  %1231 = vmatprep.subr.mxu1 %v3476_v31 }
 0x415   :  { %1161 = vmatpush1.msra.mxu0 %v3477_v32  ;;  %1194 = vmatprep.mubr.f32.mxu0 %v3478_v33 }
 0x416   :  { %1232 = vmatpush1.msra.mxu1 %v3479_v35  ;;  %1265 = vmatprep.mubr.f32.mxu1 %v3478_v33  ;;  %v3496_v35 = vld [vmem:[#allocation9_spill] sm:$0xff] }
 0x417   :  { %1300 = vmatprep.subr.mxu0 %v2771_v36  ;;  %1371 = vmatprep.subr.mxu1 %v2774_v37 }
 0x4b6   :  { %v1026_v47 = vpop.f32.mrf.mxu0  ;;  %v1097_v55 = vpop.f32.mrf.mxu1 }
 0x4b7   :  { %v1027_v48 = vadd.f32 %v1026_v47, %v193_v46  ;;  %v1098_v58 = vadd.f32 %v1097_v55, %v306_v57  ;;  %v3499_v46 = vld [vmem:[#allocation34_spill] sm:$0xff]  ;;  %v3500_v47 = vld [vmem:[#allocation35_spill] sm:$0xff]  ;;  %v2967_v55 = vld [vmem:[#allocation4 + $0xc8] sm:$0xff] }
 0x4b8   :  { %v1028_v49 = vpop.f32.mrf.mxu0  ;;  %v1099_v52 = vpop.f32.mrf.mxu1  ;;  %v2973_v57 = vld [vmem:[#allocation4 + $0xc0] sm:$0xff] }
 0x4b9   :  { %v1889_v50 = vmul.f32 -1.442695, %v1027_v48  ;;  %v1029_v53 = vadd.f32 %v1028_v49, %v3493_v51  ;;  %v1891_v14 = vmul.f32 -1.442695, %v1098_v58  ;;  %v1100_v15 = vadd.f32 %v1099_v52, %v308_v13  ;;  %v2949_v48 = vld [vmem:[#allocation4 + $0x100] sm:$0xff]  ;;  %v2952_v49 = vld [vmem:[#allocation4 + $0x110] sm:$0xff] }
 0x4ba   :  { %v2958_v51 = vld [vmem:[#allocation4 + $0xf8] sm:$0xff]  ;;  %v2976_v58 = vld [vmem:[#allocation4 + $0xd0] sm:$0xff]  ;;  %v2979_v52 = vld [vmem:[#allocation4 + $0xa8] sm:$0xff] }
 0x4bb   :  { %1974 = vpow2.f32 %v1889_v50  ;;  %v1890_v54 = vmul.f32 -1.442695, %v1029_v53  ;;  %v2955_v50 = vld [vmem:[#allocation4 + $0xe8] sm:$0xff]  ;;  %v2961_v53 = vld [vmem:[#allocation4 + $0xe0] sm:$0xff] }
 0x4bc   :  { %v2985_v13 = vld [vmem:[#allocation4 + $0xa0] sm:$0xff] }
 0x4bd   :  { %1976 = vpow2.f32 %v1890_v54  ;;  %v2964_v54 = vld [vmem:[#allocation4 + $0xf0] sm:$0xff] }
 0x4be   :  { %1978 = vpow2.f32 %v1891_v14  ;;  %v2988_v14 = vld [vmem:[#allocation4 + $0xb0] sm:$0xff] }
 0x4bf   :  { %1980 = vtanh.f32 %v1100_v15  ;;  %v2991_v15 = vld [vmem:[#allocation4 + $0x88] sm:$0xff] }
 0x4c8   :  { %v1975_v17 = vpop.eup %1974 }
 0x4c9   :  { %v1111_v18 = vadd.f32 1.0, %v1975_v17  ;;  %v2994_v17 = vld [vmem:[#allocation4 + $0x98] sm:$0xff] }
 0x4ca   :  { %v1977_v19 = vpop.eup %1976  ;;  %3501 = vst [vmem:[#allocation44_spill] sm:$0xff] %v2994_v17 }
 0x4cb   :  { %1982 = vrcp.f32 %v1111_v18  ;;  %v1112_v20 = vadd.f32 1.0, %v1977_v19  ;;  %v1979_v21 = vpop.eup %1978  ;;  %v2997_v18 = vld [vmem:[#allocation4 + $0x80] sm:$0xff]  ;;  %v3000_v19 = vld [vmem:[#allocation4 + $0x90] sm:$0xff] }
 0x4cc   :  { %v1981_v22 = vpop.eup %1980  ;;  %v1113_v27 = vadd.f32 1.0, %v1979_v21  ;;  %3502 = vst [vmem:[#allocation45_spill] sm:$0xff] %v2997_v18  ;;  %3503 = vst [vmem:[#allocation11_spill] sm:$0xff] %v3000_v19  ;;  %v3006_v21 = vld [vmem:[#allocation4 + $0x78] sm:$0xff] }
 0x4cd   :  { %1984 = vrcp.f32 %v1112_v20  ;;  %v3003_v20 = vld [vmem:[#allocation4 + $0x68] sm:$0xff]  ;;  %3505 = vst [vmem:[#allocation14_spill] sm:$0xff] %v3006_v21 }
 0x4ce   :  { %1986 = vrcp.f32 %v1113_v27  ;;  %3504 = vst [vmem:[#allocation12_spill] sm:$0xff] %v3003_v20  ;;  %v3021_v27 = vld [vmem:[#allocation4 + $0x40] sm:$0xff] }
 0x4cf   :  { %3510 = vst [vmem:[#allocation17_spill] sm:$0xff] %v3021_v27 }
 0x4d8   :  { %v1983_v23 = vpop.eup %1982 }
 0x4d9   :  { %v1122_v24 = vmul.f32 %v1983_v23, %v1981_v22  ;;  %v3009_v22 = vld [vmem:[#allocation4 + $0x60] sm:$0xff]  ;;  %v3012_v23 = vld [vmem:[#allocation4 + $0x70] sm:$0xff] }
 0x4da   :  { %v1985_v26 = vpop.eup %1984  ;;  %3506 = vst [vmem:[#allocation13_spill] sm:$0xff] %v3009_v22  ;;  %3507 = vst [vmem:[#allocation16_spill] sm:$0xff] %v3012_v23 }
 0x4db   :  { %v1121_v28 = vmul.f32 %v1985_v26, %v2785_v25  ;;  %v1987_v30 = vpop.eup %1986  ;;  %v3497_v25 = vld [vmem:[#allocation7_spill] sm:$0xff]  ;;  %v3018_v26 = vld [vmem:[#allocation4 + $0x58] sm:$0xff] }
 0x4dc   :  { %3509 = vst [vmem:[#allocation18_spill] sm:$0xff] %v3018_v26 }
 0x4dd   :  { %v2918_v29 = vadd.f32 %v1122_v24, %v1121_v28  ;;  %v3015_v24 = vld [vmem:[#allocation4 + $0x48] sm:$0xff]  ;;  %v3024_v28 = vld [vmem:[#allocation4 + $0x50] sm:$0xff] }
 0x4de   :  { %3508 = vst [vmem:[#allocation15_spill] sm:$0xff] %v3015_v24  ;;  %3511 = vst [vmem:[#allocation19_spill] sm:$0xff] %v3024_v28 }
 0x4df   :  { %1988 = vtanh.f32 %v2918_v29 }
 0x4ec   :  { %v1989_v31 = vpop.eup %1988 }
 0x4ed   :  { %v1125_v32 = vmul.f32 %v1989_v31, %v1987_v30  ;;  %v3027_v30 = vld [vmem:[#allocation4 + $0x28] sm:$0xff]  ;;  %v3030_v31 = vld [vmem:[#allocation4 + $0x38] sm:$0xff] }
 0x4ee   :  { %3512 = vst [vmem:[#allocation20_spill] sm:$0xff] %v3027_v30  ;;  %3513 = vst [vmem:[#allocation22_spill] sm:$0xff] %v3030_v31 }
 0x4ef   :  { %1195 = vmatmul.mubr.f32.vlgmr.msra.gmra.mxu0 %v1125_v32  ;;  %1266 = vmatmul.mubr.f32.vlgmr.msra.gmra.mxu1 %v1125_v32  ;;  %v3033_v32 = vld [vmem:[#allocation4 + $0x20] sm:$0xff] }
 0x4f0   :  { %1301 = vmatpush1.msra.mxu0 %v2788_v3  ;;  %1372 = vmatpush1.msra.mxu1 %v2791_v10  ;;  %3514 = vst [vmem:[#allocation21_spill] sm:$0xff] %v3033_v32 }
 0x4f1   :  { %1302 = vmatprep.subr.mxu0 %v2794_v63  ;;  %1373 = vmatprep.subr.mxu1 %v2797_v1 }
 0x4f2   :  { %1303 = vmatpush1.msra.mxu0 %v2800_v7  ;;  %1374 = vmatpush1.msra.mxu1 %v2803_v2 }
 0x4f3   :  { %1304 = vmatprep.subr.mxu0 %v2806_v60  ;;  %1375 = vmatprep.subr.mxu1 %v2809_v43 }
 0x4f4   :  { %1305 = vmatpush1.msra.mxu0 %v2812_v8  ;;  %1376 = vmatpush1.msra.mxu1 %v2815_v12 }
 0x4f5   :  { %1306 = vmatprep.subr.mxu0 %v2818_v62  ;;  %1377 = vmatprep.subr.mxu1 %v2821_v9 }
 0x4f6   :  { %1307 = vmatpush1.msra.mxu0 %v2824_v34  ;;  %1378 = vmatpush1.msra.mxu1 %v2827_v11 }
 0x4f7   :  { %1308 = vmatprep.subr.mxu0 %v2830_v39  ;;  %1379 = vmatprep.subr.mxu1 %v2833_v40 }
 0x4f8   :  { %1309 = vmatpush1.msra.mxu0 %v2836_v41  ;;  %1380 = vmatpush1.msra.mxu1 %v3496_v35 }
 0x4f9   :  { %1310 = vmatprep.subr.mxu0 %v3497_v25  ;;  %1381 = vmatprep.subr.mxu1 %v3498_v45 }
 0x4fa   :  { %1311 = vmatpush1.msra.mxu0 %v3499_v46  ;;  %1382 = vmatpush1.msra.mxu1 %v3500_v47 }
 0x4fb   :  { %1312 = vmatprep.subr.mxu0 %v2854_v61  ;;  %1383 = vmatprep.subr.mxu1 %v2857_v42 }
 0x4fc   :  { %1313 = vmatpush1.msra.mxu0 %v2860_v44  ;;  %1384 = vmatpush1.msra.mxu1 %v2863_v4 }
 0x4fd   :  { %1314 = vmatprep.subr.mxu0 %v2866_v59  ;;  %1385 = vmatprep.subr.mxu1 %v2869_v6 }
 0x4fe   :  { %1315 = vmatpush1.msra.mxu0 %v2949_v48  ;;  %1386 = vmatpush1.msra.mxu1 %v2952_v49 }
 0x4ff   :  { %1316 = vmatprep.subr.mxu0 %v2955_v50  ;;  %1387 = vmatprep.subr.mxu1 %v2958_v51 }
 0x500   :  { %1317 = vmatpush1.msra.mxu0 %v2961_v53  ;;  %1388 = vmatpush1.msra.mxu1 %v2964_v54 }
 0x501   :  { %1318 = vmatprep.subr.mxu0 %v2967_v55  ;;  %1389 = vmatprep.subr.mxu1 %v2970_v56 }
 0x502   :  { %1319 = vmatpush1.msra.mxu0 %v2973_v57  ;;  %1390 = vmatpush1.msra.mxu1 %v2976_v58 }
 0x503   :  { %1320 = vmatprep.subr.mxu0 %v2979_v52  ;;  %1391 = vmatprep.subr.mxu1 %v2982_v16 }
 0x504   :  { %1321 = vmatpush1.msra.mxu0 %v2985_v13  ;;  %1392 = vmatpush1.msra.mxu1 %v2988_v14 }
 0x505   :  { %1322 = vmatprep.subr.mxu0 %v2991_v15  ;;  %1393 = vmatprep.subr.mxu1 %v2994_v17 }
 0x506   :  { %1323 = vmatpush1.msra.mxu0 %v2997_v18  ;;  %1394 = vmatpush1.msra.mxu1 %v3000_v19 }
 0x507   :  { %1324 = vmatprep.subr.mxu0 %v3003_v20  ;;  %1395 = vmatprep.subr.mxu1 %v3006_v21 }
 0x508   :  { %1325 = vmatpush1.msra.mxu0 %v3009_v22  ;;  %1396 = vmatpush1.msra.mxu1 %v3012_v23 }
 0x509   :  { %1326 = vmatprep.subr.mxu0 %v3015_v24  ;;  %1397 = vmatprep.subr.mxu1 %v3018_v26  ;;  %v3036_v26 = vld [vmem:[#allocation4 + $0x30] sm:$0xff] }
 0x50a   :  { %1327 = vmatpush1.msra.mxu0 %v3021_v27  ;;  %1398 = vmatpush1.msra.mxu1 %v3024_v28  ;;  %3515 = vst [vmem:[#allocation24_spill] sm:$0xff] %v3036_v26  ;;  %v3039_v27 = vld [vmem:[#allocation4 + $0x8] sm:$0xff]  ;;  %v3042_v28 = vld [vmem:[#allocation4 + $0x18] sm:$0xff] }
 0x50b   :  { %1328 = vmatprep.subr.mxu0 %v3027_v30  ;;  %1399 = vmatprep.subr.mxu1 %v3030_v31  ;;  %3516 = vst [vmem:[#allocation23_spill] sm:$0xff] %v3039_v27  ;;  %3517 = vst [vmem:[#allocation26_spill] sm:$0xff] %v3042_v28  ;;  %v3045_v30 = vld [vmem:[#allocation4] sm:$0xff]  ;;  %v3049_v31 = vld [vmem:[#allocation4 + $0x10] sm:$0xff] }
 0x50c   :  { %1329 = vmatpush1.msra.mxu0 %v3033_v32  ;;  %1400 = vmatpush1.msra.mxu1 %v3036_v26  ;;  %3518 = vst [vmem:[#allocation25_spill] sm:$0xff] %v3045_v30  ;;  %3519 = vst [vmem:[#allocation28_spill] sm:$0xff] %v3049_v31 }
 0x50d   :  { %1330 = vmatprep.subr.mxu0 %v3039_v27  ;;  %1401 = vmatprep.subr.mxu1 %v3042_v28  ;;  %v3520_v27 = vld [vmem:[#allocation40_spill] sm:$0xff] }
 0x50e   :  { %1331 = vmatpush1.msra.mxu0 %v3045_v30  ;;  %1364 = vmatprep.mubr.f32.mxu0 %v3478_v33  ;;  %v199_v26 = vadd.f32 %v3520_v27, %v3482_v38  ;;  %v3521_v30 = vld [vmem:[#allocation41_spill] sm:$0xff] }
 0x50f   :  { %1402 = vmatpush1.msra.mxu1 %v3049_v31  ;;  %1435 = vmatprep.mubr.f32.mxu1 %v3478_v33  ;;  %v3522_v31 = vld [vmem:[#allocation50_spill] sm:$0xff] }
 0x510   :  { %1470 = vmatprep.subr.mxu0 %v2771_v36  ;;  %1541 = vmatprep.subr.mxu1 %v2774_v37  ;;  %v312_v33 = vadd.f32 %v3522_v31, %v3430_v0  ;;  %v3523_v37 = vld [vmem:[#allocation51_spill] sm:$0xff] }
 0x511   :  { %v314_v18 = vadd.f32 %v3523_v37, %v2488_v5 }
 0x5af   :  { %v1196_v28 = vpop.f32.mrf.mxu0  ;;  %v1267_v20 = vpop.f32.mrf.mxu1 }
 0x5b0   :  { %v1197_v32 = vadd.f32 %v1196_v28, %v199_v26  ;;  %v1268_v19 = vadd.f32 %v1267_v20, %v312_v33 }
 0x5b1   :  { %v1198_v24 = vpop.f32.mrf.mxu0  ;;  %v1269_v36 = vpop.f32.mrf.mxu1 }
 0x5b2   :  { %v1892_v23 = vmul.f32 -1.442695, %v1197_v32  ;;  %v1199_v22 = vadd.f32 %v1198_v24, %v3521_v30  ;;  %v1894_v17 = vmul.f32 -1.442695, %v1268_v19  ;;  %v1270_v27 = vadd.f32 %v1269_v36, %v314_v18  ;;  %v3526_v18 = vld [vmem:[#allocation11_spill] sm:$0xff]  ;;  %v3527_v19 = vld [vmem:[#allocation12_spill] sm:$0xff] }
 0x5b4   :  { %1990 = vpow2.f32 %v1892_v23  ;;  %v1893_v21 = vmul.f32 -1.442695, %v1199_v22 }
 0x5b6   :  { %1992 = vpow2.f32 %v1893_v21 }
 0x5b7   :  { %1994 = vpow2.f32 %v1894_v17  ;;  %v3525_v17 = vld [vmem:[#allocation45_spill] sm:$0xff] }
 0x5b8   :  { %1996 = vtanh.f32 %v1270_v27  ;;  %v3528_v27 = vld [vmem:[#allocation14_spill] sm:$0xff] }
 0x5c1   :  { %v1991_v38 = vpop.eup %1990 }
 0x5c2   :  { %v1281_v26 = vadd.f32 1.0, %v1991_v38 }
 0x5c3   :  { %v1993_v28 = vpop.eup %1992 }
 0x5c4   :  { %1998 = vrcp.f32 %v1281_v26  ;;  %v1282_v23 = vadd.f32 1.0, %v1993_v28  ;;  %v1995_v21 = vpop.eup %1994  ;;  %v3529_v26 = vld [vmem:[#allocation13_spill] sm:$0xff]  ;;  %v3530_v28 = vld [vmem:[#allocation16_spill] sm:$0xff] }
 0x5c5   :  { %v1997_v22 = vpop.eup %1996  ;;  %v1283_v33 = vadd.f32 1.0, %v1995_v21  ;;  %v3532_v21 = vld [vmem:[#allocation18_spill] sm:$0xff] }
 0x5c6   :  { %2000 = vrcp.f32 %v1282_v23  ;;  %v3531_v23 = vld [vmem:[#allocation15_spill] sm:$0xff] }
 0x5c7   :  { %2002 = vrcp.f32 %v1283_v33  ;;  %v3537_v33 = vld [vmem:[#allocation21_spill] sm:$0xff] }
 0x5d1   :  { %v1999_v24 = vpop.eup %1998 }
 0x5d2   :  { %v1292_v30 = vmul.f32 %v1999_v24, %v1997_v22  ;;  %v3533_v22 = vld [vmem:[#allocation17_spill] sm:$0xff]  ;;  %v3534_v24 = vld [vmem:[#allocation19_spill] sm:$0xff] }
 0x5d3   :  { %v2001_v31 = vpop.eup %2000 }
 0x5d4   :  { %v1291_v20 = vmul.f32 %v2001_v31, %v2918_v29  ;;  %v2003_v36 = vpop.eup %2002  ;;  %v3524_v29 = vld [vmem:[#allocation44_spill] sm:$0xff]  ;;  %v3536_v31 = vld [vmem:[#allocation22_spill] sm:$0xff] }
 0x5d6   :  { %v3063_v32 = vadd.f32 %v1292_v30, %v1291_v20  ;;  %v3535_v30 = vld [vmem:[#allocation20_spill] sm:$0xff] }
 0x5d7   :  { %v3538_v20 = vld [vmem:[#allocation24_spill] sm:$0xff] }
 0x5d8   :  { %2004 = vtanh.f32 %v3063_v32 }
 0x5e5   :  { %v2005_v37 = vpop.eup %2004 }
 0x5e6   :  { %v1295_v38 = vmul.f32 %v2005_v37, %v2003_v36  ;;  %v3539_v36 = vld [vmem:[#allocation23_spill] sm:$0xff]  ;;  %v3540_v37 = vld [vmem:[#allocation26_spill] sm:$0xff] }
 0x5e8   :  { %1365 = vmatmul.mubr.f32.vlgmr.msra.gmra.mxu0 %v1295_v38  ;;  %1436 = vmatmul.mubr.f32.vlgmr.msra.gmra.mxu1 %v1295_v38  ;;  %v3541_v38 = vld [vmem:[#allocation25_spill] sm:$0xff] }
 0x5e9   :  { %1471 = vmatpush1.msra.mxu0 %v2788_v3  ;;  %1542 = vmatpush1.msra.mxu1 %v2791_v10 }
 0x5ea   :  { %1472 = vmatprep.subr.mxu0 %v2794_v63  ;;  %1543 = vmatprep.subr.mxu1 %v2797_v1 }
 0x5eb   :  { %1473 = vmatpush1.msra.mxu0 %v2800_v7  ;;  %1544 = vmatpush1.msra.mxu1 %v2803_v2 }
 0x5ec   :  { %1474 = vmatprep.subr.mxu0 %v2806_v60  ;;  %1545 = vmatprep.subr.mxu1 %v2809_v43 }
 0x5ed   :  { %1475 = vmatpush1.msra.mxu0 %v2812_v8  ;;  %1546 = vmatpush1.msra.mxu1 %v2815_v12 }
 0x5ee   :  { %1476 = vmatprep.subr.mxu0 %v2818_v62  ;;  %1547 = vmatprep.subr.mxu1 %v2821_v9 }
 0x5ef   :  { %1477 = vmatpush1.msra.mxu0 %v2824_v34  ;;  %1548 = vmatpush1.msra.mxu1 %v2827_v11 }
 0x5f0   :  { %1478 = vmatprep.subr.mxu0 %v2830_v39  ;;  %1549 = vmatprep.subr.mxu1 %v2833_v40 }
 0x5f1   :  { %1479 = vmatpush1.msra.mxu0 %v2836_v41  ;;  %1550 = vmatpush1.msra.mxu1 %v3496_v35 }
 0x5f2   :  { %1480 = vmatprep.subr.mxu0 %v3497_v25  ;;  %1551 = vmatprep.subr.mxu1 %v3498_v45 }
 0x5f3   :  { %1481 = vmatpush1.msra.mxu0 %v3499_v46  ;;  %1552 = vmatpush1.msra.mxu1 %v3500_v47 }
 0x5f4   :  { %1482 = vmatprep.subr.mxu0 %v2854_v61  ;;  %1553 = vmatprep.subr.mxu1 %v2857_v42 }
 0x5f5   :  { %1483 = vmatpush1.msra.mxu0 %v2860_v44  ;;  %1554 = vmatpush1.msra.mxu1 %v2863_v4 }
 0x5f6   :  { %1484 = vmatprep.subr.mxu0 %v2866_v59  ;;  %1555 = vmatprep.subr.mxu1 %v2869_v6 }
 0x5f7   :  { %1485 = vmatpush1.msra.mxu0 %v2949_v48  ;;  %1556 = vmatpush1.msra.mxu1 %v2952_v49 }
 0x5f8   :  { %1486 = vmatprep.subr.mxu0 %v2955_v50  ;;  %1557 = vmatprep.subr.mxu1 %v2958_v51 }
 0x5f9   :  { %1487 = vmatpush1.msra.mxu0 %v2961_v53  ;;  %1558 = vmatpush1.msra.mxu1 %v2964_v54 }
 0x5fa   :  { %1488 = vmatprep.subr.mxu0 %v2967_v55  ;;  %1559 = vmatprep.subr.mxu1 %v2970_v56 }
 0x5fb   :  { %1489 = vmatpush1.msra.mxu0 %v2973_v57  ;;  %1560 = vmatpush1.msra.mxu1 %v2976_v58 }
 0x5fc   :  { %1490 = vmatprep.subr.mxu0 %v2979_v52  ;;  %1561 = vmatprep.subr.mxu1 %v2982_v16 }
 0x5fd   :  { %1491 = vmatpush1.msra.mxu0 %v2985_v13  ;;  %1562 = vmatpush1.msra.mxu1 %v2988_v14 }
 0x5fe   :  { %1492 = vmatprep.subr.mxu0 %v2991_v15  ;;  %1563 = vmatprep.subr.mxu1 %v3524_v29 }
 0x5ff   :  { %1493 = vmatpush1.msra.mxu0 %v3525_v17  ;;  %1564 = vmatpush1.msra.mxu1 %v3526_v18 }
 0x600   :  { %1494 = vmatprep.subr.mxu0 %v3527_v19  ;;  %1565 = vmatprep.subr.mxu1 %v3528_v27 }
 0x601   :  { %1495 = vmatpush1.msra.mxu0 %v3529_v26  ;;  %1566 = vmatpush1.msra.mxu1 %v3530_v28 }
 0x602   :  { %1496 = vmatprep.subr.mxu0 %v3531_v23  ;;  %1567 = vmatprep.subr.mxu1 %v3532_v21  ;;  %v3542_v23 = vmov 0.0   ;;  %v3543_v21 = vld [vmem:[#allocation28_spill] sm:$0xff] }
 0x603   :  { %1497 = vmatpush1.msra.mxu0 %v3533_v22  ;;  %1568 = vmatpush1.msra.mxu1 %v3534_v24  ;;  %v3544_v24 = vld [vmem:[#allocation33_spill] sm:$0xff] }
 0x604   :  { %1498 = vmatprep.subr.mxu0 %v3535_v30  ;;  %1569 = vmatprep.subr.mxu1 %v3536_v31  ;;  %v3545_v30 = vld [vmem:[#allocation10_spill] sm:$0xff]  ;;  %v3546_v31 = vld [vmem:[#allocation32_spill] sm:$0xff] }
 0x605   :  { %1499 = vmatpush1.msra.mxu0 %v3537_v33  ;;  %1570 = vmatpush1.msra.mxu1 %v3538_v20  ;;  %v3547_v33 = vld [vmem:[#allocation42_spill] sm:$0xff] }
 0x606   :  { %1500 = vmatprep.subr.mxu0 %v3539_v36  ;;  %1571 = vmatprep.subr.mxu1 %v3540_v37  ;;  %v205_v22 = vadd.f32 %v3547_v33, %v3546_v31  ;;  %v3548_v37 = vld [vmem:[#allocation43_spill] sm:$0xff] }
 0x607   :  { %1501 = vmatpush1.msra.mxu0 %v3541_v38  ;;  %1534 = vmatprep.mubr.f32.mxu0 %v3542_v23 }
 0x608   :  { %1572 = vmatpush1.msra.mxu1 %v3543_v21  ;;  %1605 = vmatprep.mubr.f32.mxu1 %v3542_v23  ;;  %v3549_v21 = vld [vmem:[#allocation52_spill] sm:$0xff] }
 0x609   :  { %1658 = vmatprep.subr.mxu0 %v3544_v24  ;;  %1729 = vmatprep.subr.mxu1 %v3545_v30  ;;  %v318_v23 = vadd.f32 %v3549_v21, %v3430_v0  ;;  %v3550_v30 = vld [vmem:[#allocation54_spill] sm:$0xff] }
 0x60a   :  { %v320_v17 = vadd.f32 %v3550_v30, %v2488_v5 }
 0x6a8   :  { %v1366_v20 = vpop.f32.mrf.mxu0  ;;  %v1437_v19 = vpop.f32.mrf.mxu1 }
 0x6a9   :  { %v1367_v28 = vadd.f32 %v1366_v20, %v205_v22  ;;  %v1438_v18 = vadd.f32 %v1437_v19, %v318_v23 }
 0x6aa   :  { %v1368_v36 = vpop.f32.mrf.mxu0  ;;  %v1439_v24 = vpop.f32.mrf.mxu1 }
 0x6ab   :  { %v1895_v26 = vmul.f32 -1.442695, %v1367_v28  ;;  %v1369_v27 = vadd.f32 %v1368_v36, %v3548_v37  ;;  %v1897_v29 = vmul.f32 -1.442695, %v1438_v18  ;;  %v1440_v33 = vadd.f32 %v1439_v24, %v320_v17 }
 0x6ad   :  { %2006 = vpow2.f32 %v1895_v26  ;;  %v1896_v38 = vmul.f32 -1.442695, %v1369_v27 }
 0x6af   :  { %2008 = vpow2.f32 %v1896_v38 }
 0x6b0   :  { %2010 = vpow2.f32 %v1897_v29 }
 0x6b1   :  { %2012 = vtanh.f32 %v1440_v33 }
 0x6ba   :  { %v2007_v31 = vpop.eup %2006 }
 0x6bb   :  { %v1451_v22 = vadd.f32 1.0, %v2007_v31 }
 0x6bc   :  { %v2009_v28 = vpop.eup %2008 }
 0x6bd   :  { %2014 = vrcp.f32 %v1451_v22  ;;  %v1452_v26 = vadd.f32 1.0, %v2009_v28  ;;  %v2011_v27 = vpop.eup %2010 }
 0x6be   :  { %v2013_v20 = vpop.eup %2012  ;;  %v1453_v19 = vadd.f32 1.0, %v2011_v27 }
 0x6bf   :  { %2016 = vrcp.f32 %v1452_v26 }
 0x6c0   :  { %2018 = vrcp.f32 %v1453_v19  ;;  %v3577_v19 = vld [vmem:[#allocation30_spill] sm:$0xff] }
 0x6ca   :  { %v2015_v36 = vpop.eup %2014 }
 0x6cb   :  { %v1462_v37 = vmul.f32 %v2015_v36, %v2013_v20 }
 0x6cc   :  { %v2017_v21 = vpop.eup %2016 }
 0x6cd   :  { %v1461_v23 = vmul.f32 %v2017_v21, %v3063_v32  ;;  %v2019_v17 = vpop.eup %2018  ;;  %v1636_v21 = vld [vmem:[%s3239_s3] sm:$0xf] }
 0x6cf   :  { %v3140_v38 = vadd.f32 %v1462_v37, %v1461_v23  ;;  %v3578_v23 = vsub.s32 0, %v3577_v19 }
 0x6d1   :  { %2020 = vtanh.f32 %v3140_v38 }
 0x6de   :  { %v2021_v29 = vpop.eup %2020 }
 0x6df   :  { %v1465_v18 = vmul.f32 %v2021_v29, %v2019_v17  ;;  %v1641_v17 = vrot.slane %v1636_v21, %v3578_v23  ;;  %v3579_v29 = vsub.s32 1, %v3577_v19 }
 0x6e1   :  { %1535 = vmatmul.mubr.f32.vlgmr.msra.gmra.mxu0 %v1465_v18  ;;  %1606 = vmatmul.mubr.f32.vlgmr.msra.gmra.mxu1 %v1465_v18  ;;  %v1645_v18 = vrot.slane %v1636_v21, %v3579_v29 }
 0x6e2   :  { %1659 = vmatpush1.msra.mxu0 %v2788_v3  ;;  %1730 = vmatpush1.msra.mxu1 %v2791_v10  ;;  %v3551_v3 = vld [vmem:[#allocation44_spill] sm:$0xff]  ;;  %v3552_v10 = vld [vmem:[#allocation45_spill] sm:$0xff] }
 0x6e3   :  { %1660 = vmatprep.subr.mxu0 %v2794_v63  ;;  %1731 = vmatprep.subr.mxu1 %v2797_v1  ;;  %v3553_v63 = vld [vmem:[#allocation11_spill] sm:$0xff]  ;;  %v3554_v1 = vld [vmem:[#allocation12_spill] sm:$0xff] }
 0x6e4   :  { %1661 = vmatpush1.msra.mxu0 %v2800_v7  ;;  %1732 = vmatpush1.msra.mxu1 %v2803_v2  ;;  %v3555_v7 = vld [vmem:[#allocation14_spill] sm:$0xff]  ;;  %v3556_v2 = vld [vmem:[#allocation13_spill] sm:$0xff] }
 0x6e5   :  { %1662 = vmatprep.subr.mxu0 %v2806_v60  ;;  %1733 = vmatprep.subr.mxu1 %v2809_v43  ;;  %v3557_v60 = vld [vmem:[#allocation16_spill] sm:$0xff]  ;;  %v3558_v43 = vld [vmem:[#allocation15_spill] sm:$0xff] }
 0x6e6   :  { %1663 = vmatpush1.msra.mxu0 %v2812_v8  ;;  %1734 = vmatpush1.msra.mxu1 %v2815_v12  ;;  %v3559_v8 = vld [vmem:[#allocation18_spill] sm:$0xff]  ;;  %v3560_v12 = vld [vmem:[#allocation17_spill] sm:$0xff] }
 0x6e7   :  { %1664 = vmatprep.subr.mxu0 %v2818_v62  ;;  %1735 = vmatprep.subr.mxu1 %v2821_v9  ;;  %v3561_v62 = vld [vmem:[#allocation19_spill] sm:$0xff]  ;;  %v3562_v9 = vld [vmem:[#allocation20_spill] sm:$0xff] }
 0x6e8   :  { %1665 = vmatpush1.msra.mxu0 %v2824_v34  ;;  %1736 = vmatpush1.msra.mxu1 %v2827_v11  ;;  %v3563_v34 = vld [vmem:[#allocation22_spill] sm:$0xff]  ;;  %v3564_v11 = vld [vmem:[#allocation21_spill] sm:$0xff] }
 0x6e9   :  { %1666 = vmatprep.subr.mxu0 %v2830_v39  ;;  %1737 = vmatprep.subr.mxu1 %v2833_v40  ;;  %v3565_v39 = vld [vmem:[#allocation24_spill] sm:$0xff]  ;;  %v3566_v40 = vld [vmem:[#allocation23_spill] sm:$0xff] }
 0x6ea   :  { %1667 = vmatpush1.msra.mxu0 %v2836_v41  ;;  %1738 = vmatpush1.msra.mxu1 %v3496_v35  ;;  %v3567_v41 = vld [vmem:[#allocation26_spill] sm:$0xff] }
 0x6eb   :  { %1668 = vmatprep.subr.mxu0 %v3497_v25  ;;  %1739 = vmatprep.subr.mxu1 %v3498_v45  ;;  %v3573_v45 = vld [vmem:[#allocation31_spill] sm:$0xff] }
 0x6ec   :  { %1669 = vmatpush1.msra.mxu0 %v3499_v46  ;;  %1740 = vmatpush1.msra.mxu1 %v3500_v47  ;;  %v3574_v46 = vld [vmem:[#allocation55_spill] sm:$0xff] }
 0x6ed   :  { %1670 = vmatprep.subr.mxu0 %v2854_v61  ;;  %1741 = vmatprep.subr.mxu1 %v2857_v42  ;;  %v3568_v42 = vld [vmem:[#allocation25_spill] sm:$0xff]  ;;  %v213_v47 = vadd.f32 %v3574_v46, %v3573_v45 }
 0x6ee   :  { %1671 = vmatpush1.msra.mxu0 %v2860_v44  ;;  %1742 = vmatpush1.msra.mxu1 %v2863_v4  ;;  %v3569_v44 = vmov 0.0   ;;  %v3570_v4 = vld [vmem:[#allocation28_spill] sm:$0xff]  ;;  %v3572_v61 = vld [vmem:[#allocation53_spill] sm:$0xff] }
 0x6ef   :  { %1672 = vmatprep.subr.mxu0 %v2866_v59  ;;  %1743 = vmatprep.subr.mxu1 %v2869_v6  ;;  %v1904_v59 = vld [vmem:[%s3240_s4] ss:$0 sm:$0xff]  ;;  %v3571_v6 = vld [vmem:[#allocation32_spill] sm:$0xff] }
 0x6f0   :  { %1673 = vmatpush1.msra.mxu0 %v2949_v48  ;;  %1744 = vmatpush1.msra.mxu1 %v2952_v49  ;;  %v211_v35 = vadd.f32 %v3572_v61, %v3571_v6 }
 0x6f1   :  { %1674 = vmatprep.subr.mxu0 %v2955_v50  ;;  %1745 = vmatprep.subr.mxu1 %v2958_v51 }
 0x6f2   :  { %1675 = vmatpush1.msra.mxu0 %v2961_v53  ;;  %1746 = vmatpush1.msra.mxu1 %v2964_v54 }
 0x6f3   :  { %1676 = vmatprep.subr.mxu0 %v2967_v55  ;;  %1747 = vmatprep.subr.mxu1 %v2970_v56  ;;  %v3575_v55 = vld [vmem:[#allocation56_spill] sm:$0xff] }
 0x6f4   :  { %1677 = vmatpush1.msra.mxu0 %v2973_v57  ;;  %1748 = vmatpush1.msra.mxu1 %v2976_v58  ;;  %v324_v56 = vadd.f32 %v3575_v55, %v3430_v0  ;;  %v1905_v55 = vld [vmem:[#allocation3] ss:$0 sm:$0xff] }
 0x6f5   :  { %1678 = vmatprep.subr.mxu0 %v2979_v52  ;;  %1749 = vmatprep.subr.mxu1 %v2982_v16  ;;  %v3576_v52 = vld [vmem:[#allocation57_spill] sm:$0xff] }
 0x6f6   :  { %1679 = vmatpush1.msra.mxu0 %v2985_v13  ;;  %1750 = vmatpush1.msra.mxu1 %v2988_v14  ;;  %v326_v16 = vadd.f32 %v3576_v52, %v2488_v5 }
 0x6f7   :  { %1680 = vmatprep.subr.mxu0 %v2991_v15  ;;  %1751 = vmatprep.subr.mxu1 %v3551_v3 }
 0x6f8   :  { %1681 = vmatpush1.msra.mxu0 %v3552_v10  ;;  %1752 = vmatpush1.msra.mxu1 %v3553_v63 }
 0x6f9   :  { %1682 = vmatprep.subr.mxu0 %v3554_v1  ;;  %1753 = vmatprep.subr.mxu1 %v3555_v7 }
 0x6fa   :  { %1683 = vmatpush1.msra.mxu0 %v3556_v2  ;;  %1754 = vmatpush1.msra.mxu1 %v3557_v60  ;;  %v3580_v2 = vsub.s32 2, %v3577_v19 }
 0x6fb   :  { %1684 = vmatprep.subr.mxu0 %v3558_v43  ;;  %1755 = vmatprep.subr.mxu1 %v3559_v8 }
 0x6fc   :  { %1685 = vmatpush1.msra.mxu0 %v3560_v12  ;;  %1756 = vmatpush1.msra.mxu1 %v3561_v62  ;;  %v1649_v60 = vrot.slane %v1636_v21, %v3580_v2  ;;  %v3581_v12 = vsub.s32 3, %v3577_v19 }
 0x6fd   :  { %1686 = vmatprep.subr.mxu0 %v3562_v9  ;;  %1757 = vmatprep.subr.mxu1 %v3563_v34 }
 0x6fe   :  { %1687 = vmatpush1.msra.mxu0 %v3564_v11  ;;  %1758 = vmatpush1.msra.mxu1 %v3565_v39  ;;  %v1653_v62 = vrot.slane %v1636_v21, %v3581_v12 }
 0x6ff   :  { %1688 = vmatprep.subr.mxu0 %v3566_v40  ;;  %1759 = vmatprep.subr.mxu1 %v3567_v41 }
 0x700   :  { %1689 = vmatpush1.msra.mxu0 %v3568_v42  ;;  %1722 = vmatprep.mubr.f32.mxu0 %v3569_v44 }
 0x701   :  { %1760 = vmatpush1.msra.mxu1 %v3570_v4  ;;  %1793 = vmatprep.mubr.f32.mxu1 %v3569_v44 }
 0x702   :  { %1830 = vrot.lane.b32.xlu0 %v1904_v59, %s2144_s12 }
 0x7a1   :  { %v1536_v25 = vpop.f32.mrf.mxu0  ;;  %v1607_v54 = vpop.f32.mrf.mxu1 }
 0x7a2   :  { %v1537_v48 = vadd.f32 %v1536_v25, %v211_v35  ;;  %v1608_v57 = vadd.f32 %v1607_v54, %v324_v56  ;;  %v2145_v54 = vmov 0  }
 0x7a3   :  { %v1538_v49 = vpop.f32.mrf.mxu0  ;;  %v1609_v58 = vpop.f32.mrf.mxu1  ;;  %1912 = vset.pattern.permute.xlu1 %v2145_v54  ;;  %1913 = vset.pattern.permute.xlu0 %v2145_v54 }
 0x7a4   :  { %v1898_v50 = vmul.f32 -1.442695, %v1537_v48  ;;  %v1539_v51 = vadd.f32 %v1538_v49, %v213_v47  ;;  %v1900_v13 = vmul.f32 -1.442695, %v1608_v57  ;;  %v1610_v15 = vadd.f32 %v1609_v58, %v326_v16  ;;  %v1831_v48 = vpop.permute.xlu0 %1830 }
 0x7a6   :  { %2022 = vpow2.f32 %v1898_v50  ;;  %v1899_v53 = vmul.f32 -1.442695, %v1539_v51 }
 0x7a8   :  { %2024 = vpow2.f32 %v1899_v53 }
 0x7a9   :  { %2026 = vpow2.f32 %v1900_v13 }
 0x7b3   :  { %v2023_v14 = vpop.eup %2022 }
 0x7b4   :  { %v1621_v32 = vadd.f32 1.0, %v2023_v14 }
 0x7b5   :  { %v2025_v31 = vpop.eup %2024 }
 0x7b6   :  { %2028 = vrcp.f32 %v1621_v32  ;;  %v1622_v24 = vadd.f32 1.0, %v2025_v31  ;;  %v2027_v30 = vpop.eup %2026 }
 0x7b7   :  { %2030 = vtanh.f32 %v1610_v15  ;;  %v1623_v0 = vadd.f32 1.0, %v2027_v30 }
 0x7b8   :  { %2032 = vrcp.f32 %v1622_v24 }
 0x7b9   :  { %2034 = vrcp.f32 %v1623_v0 }
 0x7c3   :  { %v2029_v33 = vpop.eup %2028 }
 0x7c4   :  { %v2031_v22 = vpop.eup %2030 }
 0x7c5   :  { %v2033_v28 = vpop.eup %2032  ;;  %v1632_v27 = vmul.f32 %v2031_v22, %v2029_v33 }
 0x7c6   :  { %v1631_v26 = vmul.f32 %v2033_v28, %v3140_v38  ;;  %v2035_v5 = vpop.eup %2034 }
 0x7c8   :  { %v1633_v20 = vadd.f32 %v1632_v27, %v1631_v26 }
 0x7ca   :  { %2036 = vtanh.f32 %v1633_v20 }
 0x7d7   :  { %v2037_v36 = vpop.eup %2036 }
 0x7d8   :  { %v1635_v37 = vmul.f32 %v2037_v36, %v2035_v5 }
 0x7da   :  { %1723 = vmatmul.mubr.f32.vlgmr.msra.gmra.mxu0 %v1635_v37  ;;  %1794 = vmatmul.mubr.f32.vlgmr.msra.gmra.mxu1 %v1635_v37 }
 0x89a   :  { %v1724_v38 = vpop.f32.mrf.mxu0  ;;  %v1795_v43 = vpop.f32.mrf.mxu1 }
 0x89b   :  { %v1725_v3 = vadd.f32 %v1724_v38, %v1641_v17  ;;  %v1796_v8 = vadd.f32 %v1795_v43, %v1649_v60 }
 0x89c   :  { %v1726_v10 = vpop.f32.mrf.mxu0  ;;  %v1797_v9 = vpop.f32.mrf.mxu1 }
 0x89d   :  { %v1901_v63 = vmul.f32 -1.442695, %v1725_v3  ;;  %v1727_v1 = vadd.f32 %v1726_v10, %v1645_v18  ;;  %v1903_v34 = vmul.f32 -1.442695, %v1796_v8  ;;  %v1798_v39 = vadd.f32 %v1797_v9, %v1653_v62 }
 0x89f   :  { %2038 = vpow2.f32 %v1901_v63  ;;  %v1902_v7 = vmul.f32 -1.442695, %v1727_v1 }
 0x8a1   :  { %2040 = vpow2.f32 %v1902_v7 }
 0x8a2   :  { %2042 = vpow2.f32 %v1903_v34 }
 0x8ac   :  { %v2039_v11 = vpop.eup %2038 }
 0x8ad   :  { %v1803_v40 = vadd.f32 1.0, %v2039_v11 }
 0x8ae   :  { %v2041_v41 = vpop.eup %2040 }
 0x8af   :  { %2044 = vrcp.f32 %v1803_v40  ;;  %v1809_v42 = vadd.f32 1.0, %v2041_v41  ;;  %v2043_v44 = vpop.eup %2042 }
 0x8b0   :  { %2046 = vtanh.f32 %v1798_v39  ;;  %v1815_v61 = vadd.f32 1.0, %v2043_v44 }
 0x8b1   :  { %2048 = vrcp.f32 %v1809_v42 }
 0x8b2   :  { %2050 = vrcp.f32 %v1815_v61 }
 0x8bc   :  { %v2045_v4 = vpop.eup %2044 }
 0x8bd   :  { %v2047_v59 = vpop.eup %2046 }
 0x8be   :  { %v2049_v6 = vpop.eup %2048  ;;  %v1820_v35 = vmul.f32 %v2047_v59, %v2045_v4 }
 0x8bf   :  { %v1819_v25 = vmul.f32 %v2049_v6, %v1633_v20  ;;  %v2051_v46 = vpop.eup %2050 }
 0x8c1   :  { %v1821_v45 = vadd.f32 %v1820_v35, %v1819_v25 }
 0x8c3   :  { %2052 = vtanh.f32 %v1821_v45 }
 0x8d0   :  { %v2053_v47 = vpop.eup %2052 }
 0x8d1   :  { %v1823_v49 = vmul.f32 %v2053_v47, %v2051_v46 }
 0x8d3   :  { %v1833_v50 = vmul.f32 %v1831_v48, %v1823_v49 }
 0x8d5   :  { %1835 = vrot.lane.b32.xlu0 %v1833_v50, %s2144_s12 }
 0x947   :  { %v1836_v51 = vpop.permute.xlu0 %1835 }
 0x948   :  { %v1838_v53 = vsel %vm379_vm1, %v1836_v51, 0.0 }
 0x949   :  { %1839 = vadd.xlane.f32.xlu1 %v1838_v53 }
 0x9d2   :  { %v1840_v56 = vpop.xlane.xlu1 %1839 }
 0x9d3   :  { %v1848_v57 = vadd.f32 %v1905_v55, %v1840_v56 }
 0x9d5   :  { %1851 = vperm.xlu1 %1912, %v1848_v57  }
 0xa50   :  { %v1852_v58 = vpop.permute.xlu1 %1851 }
 0xa51   :  { %1854 = vst [vmem:[%s3242_s6] sm:$0xff] %v1852_v58 }
 0xa52   :  { %1859 = vsyncpa [#allocation5], 1 }

</bundles_post_ra>
